<compile_context>
chip_gen: v7x
topology: tpu7x:2x2x1
jax: 0.10.0
libtpu: 0.0.40
codegen_flags: <defaults>
</compile_context>

<pallas_src>
import functools

import numpy as np
import jax
import jax.numpy as jnp
from jax.experimental import pallas as pl
from jax.experimental.pallas import tpu as pltpu


# --------------------------------------------------------------------------
# Basis construction (numpy glue, mirrors the PyTorch helpers exactly)
# --------------------------------------------------------------------------
def hermite_poly(X, n):
    coeff = [0] * n + [1]
    return np.polynomial.hermite_e.hermeval(X, coeff)


def onescale_grid_hermite_gaussian(size, scale, max_order=None):
    max_order = max_order or size - 1
    X = np.linspace(-(size // 2), size // 2, size)
    Y = np.linspace(-(size // 2), size // 2, size)
    order_y, order_x = np.indices([max_order + 1, max_order + 1])
    G = np.exp(-X ** 2 / (2 * scale ** 2)) / scale
    basis_x = np.stack([G * hermite_poly(X / scale, n) for n in order_x.ravel()])
    basis_y = np.stack([G * hermite_poly(Y / scale, n) for n in order_y.ravel()])
    # outer product per function: [num_funcs, size, size]
    basis = basis_x[:, :, None] * basis_y[:, None, :]
    return basis


def steerable_A(size, scales, effective_size):
    max_order = effective_size - 1
    max_scale = max(scales)
    basis_tensors = []
    for scale in scales:
        size_before_pad = int(size * scale / max_scale) // 2 * 2 + 1
        basis = onescale_grid_hermite_gaussian(size_before_pad, scale, max_order)
        pad_size = (size - size_before_pad) // 2
        basis = np.pad(basis, ((0, 0), (pad_size, pad_size), (pad_size, pad_size)))
        basis_tensors.append(basis)
    return np.stack(basis_tensors, 1)  # [num_funcs, num_scales, size, size]


def normalize_basis_by_min_scale(basis):
    norm = np.sqrt((basis ** 2).sum(axis=(2, 3), keepdims=True))[:, [0]]
    return basis / norm


def _round_up(v, m):
    return (v + m - 1) // m * m


# --------------------------------------------------------------------------
# Pallas kernel: per (b, s) -> im2col in VMEM scratch + one big MXU dot
# --------------------------------------------------------------------------
def _ses_conv_kernel(x_ref, k_ref, b_ref, o_ref, col_ref, *, ksize, w_row, p_cols, ic,
                     final_layer):
    # x_ref  : (1, 1, IC, L)   bf16 lane-flattened scale-window input for this (b, s)
    # k_ref  : (S, O, K)       bf16 per-scale kernels (resident, constant index map)
    # b_ref  : (O, 1)          f32 bias (resident)
    # o_ref  : (1, 1, O, P)    f32 lane-dense output slab (P multiple of 128)
    # col_ref: (K, P)          bf16 im2col scratch
    s = pl.program_id(1)

    # --- im2col: tap (kh, kw) is a contiguous lane slice at offset kh*w_row + kw ---
    # 49 shifted-slice copies (all scale offsets / channels written at once per tap);
    # no 2D slice -> flat reshape relayouts and no per-tap dots.
    for kh in range(ksize):
        for kw in range(ksize):
            t = kh * ksize + kw
            off = kh * w_row + kw
            col_ref[t * ic:(t + 1) * ic, :] = x_ref[0, 0, :, off:off + p_cols]

    # --- single contraction-aligned MXU dot: [O, K] x [K, P], f32 accumulation ---
    acc = jnp.dot(k_ref[s], col_ref[...], preferred_element_type=jnp.float32)
    out = acc + b_ref[...]          # (O, 1) broadcasts over P lanes
    if not final_layer:
        out = jnp.maximum(out, 0.0)
    o_ref[0, 0] = out.astype(o_ref.dtype)


def ses_conv_h_h(x, weight, bias, basis, *, scale_size, kernel_size, stride=1,
                 padding=0, final_layer=False, compute_dtype=jnp.bfloat16):
    """x: [B, C, S, H, W] float32 -> [B, O, S, H_out, W_out] float32."""
    assert stride == 1  # TODO(synk): strided conv not implemented inside the Pallas kernel
    B, C, S, H, W = x.shape
    O = weight.shape[0]
    k = kernel_size
    IC = scale_size * C
    K = k * k * IC

    H_pad, W_pad = H + 2 * padding, W + 2 * padding
    H_out, W_out = H_pad - k + 1, W_pad - k + 1

    # Lane-flattened spatial layout with row pitch W_row (= W_pad).
    W_row = W_pad
    P_out = H_out * W_row                    # valid flattened output extent
    P = _round_up(P_out, 128)                # lane-dense dot / store width
    max_off = (k - 1) * W_row + (k - 1)      # largest tap shift
    L = _round_up(P + max_off, 128)          # flattened input length per (i, c) row

    # kernel = weight @ basis  (tiny contraction in f32; laid out [S, O, (kh, kw, i, c)]
    # to match the im2col row ordering), then cast to bf16 for the MXU.
    kern = jnp.einsum('ocif,fskl->soklic', weight, basis).reshape(S, O, K)
    kern = kern.astype(compute_dtype)

    # Pad spatial + scale dims, replicate the scale window, merge (i, c), flatten spatial.
    xp = jnp.pad(x, ((0, 0), (0, 0), (0, scale_size - 1),
                     (padding, padding), (padding, padding)))
    xw = jnp.stack([xp[:, :, i:i + S] for i in range(scale_size)], axis=1)
    # xw: [B, scale_size, C, S, H_pad, W_pad] -> [B, S, IC, H_pad*W_pad] -> pad lanes to L
    xw = xw.transpose(0, 3, 1, 2, 4, 5).reshape(B, S, IC, H_pad * W_pad)
    xw = jnp.pad(xw, ((0, 0), (0, 0), (0, 0), (0, L - H_pad * W_pad)))
    xw = xw.astype(compute_dtype)

    bias2 = bias.reshape(O, 1).astype(jnp.float32)

    kernel_fn = functools.partial(
        _ses_conv_kernel, ksize=k, w_row=W_row, p_cols=P, ic=IC,
        final_layer=final_layer)

    # TODO(synk): for production-size H/W/C (v7x: 64 MiB VMEM) add a grid axis that tiles
    # H_out into row blocks so the (K, P) im2col scratch stays within the VMEM budget.
    out_flat = pl.pallas_call(
        kernel_fn,
        out_shape=jax.ShapeDtypeStruct((B, S, O, P), jnp.float32),
        grid_spec=pltpu.PrefetchScalarGridSpec(
            num_scalar_prefetch=0,
            grid=(B, S),
            in_specs=[
                pl.BlockSpec((1, 1, IC, L), lambda b, s: (b, s, 0, 0)),
                pl.BlockSpec((S, O, K), lambda b, s: (0, 0, 0)),   # resident (fetched once)
                pl.BlockSpec((O, 1), lambda b, s: (0, 0)),         # resident (fetched once)
            ],
            out_specs=pl.BlockSpec((1, 1, O, P), lambda b, s: (b, s, 0, 0)),
            scratch_shapes=[pltpu.VMEM((K, P), compute_dtype)],
        ),
        compiler_params=pltpu.CompilerParams(
            dimension_semantics=("parallel", "parallel"),
            vmem_limit_bytes=32 * 1024 * 1024),
    )(xw, kern, bias2)

    # Strip the row-pitch padding and return to [B, O, S, H_out, W_out].
    out = out_flat[..., :P_out].reshape(B, S, O, H_out, W_row)[..., :W_out]
    out = out.transpose(0, 2, 1, 3, 4)
    return out.astype(x.dtype)


# --------------------------------------------------------------------------
# Pure-JAX reference (mirrors the PyTorch forward) for verification
# --------------------------------------------------------------------------
def reference_forward(x, weight, bias, basis, scale_size, padding, final_layer):
    B, C, S, H, W = x.shape
    k = basis.shape[-1]
    kern = jnp.einsum('ocif,fskl->socikl', weight, basis)  # [S, O, C, i, kh, kw]
    xp = jnp.pad(x, ((0, 0), (0, 0), (0, scale_size - 1),
                     (padding, padding), (padding, padding)))
    H_out = H + 2 * padding - k + 1
    W_out = W + 2 * padding - k + 1
    out = jnp.zeros((B, kern.shape[1], S, H_out, W_out), jnp.float32)
    for i in range(scale_size):
        for kh in range(k):
            for kw in range(k):
                patch = xp[:, :, i:i + S, kh:kh + H_out, kw:kw + W_out]  # [B,C,S,H_out,W_out]
                out = out + jnp.einsum('bcshw,soc->boshw', patch, kern[:, :, :, i, kh, kw])
    out = out + bias.reshape(1, -1, 1, 1, 1)
    if not final_layer:
        out = jnp.maximum(out, 0.0)
    return out


# --------------------------------------------------------------------------
if __name__ == "__main__":
    # Module config (small, consistent with SESConv_H_H defaults)
    B, Cin, Cout = 2, 4, 8
    scale_size = 2
    kernel_size = 7
    effective_size = 3
    scales = [1.0, 1.26, 1.59]
    padding = 3
    S = len(scales)
    H = W = 16

    # Fixed (non-learned) steerable basis buffer
    basis_np = normalize_basis_by_min_scale(
        steerable_A(kernel_size, scales, effective_size))
    basis = jnp.asarray(basis_np, jnp.float32)        # [num_funcs, S, k, k]
    num_funcs = basis.shape[0]

    # Deterministic synthetic parameters (shapes from the module's __init__)
    key = jax.random.PRNGKey(0)
    kw_key, kb_key, kx_key = jax.random.split(key, 3)
    fan_in = Cin * scale_size * num_funcs
    bound = 1.0 / np.sqrt(fan_in)                      # kaiming_uniform(a=sqrt(5)) bound
    weight = jax.random.uniform(kw_key, (Cout, Cin, scale_size, num_funcs),
                                jnp.float32, -bound, bound)
    bias = jax.random.uniform(kb_key, (Cout,), jnp.float32, -0.1, 0.1)
    x = jax.random.normal(kx_key, (B, Cin, S, H, W), jnp.float32)

    out = ses_conv_h_h(x, weight, bias, basis,
                       scale_size=scale_size, kernel_size=kernel_size,
                       stride=1, padding=padding, final_layer=False)
    out = jax.block_until_ready(out)

    ref = reference_forward(x, weight, bias, basis, scale_size, padding, False)
    # bf16 inputs with f32 accumulation: tolerance relaxed vs the pure-f32 check.
    np.testing.assert_allclose(np.asarray(out), np.asarray(ref), rtol=2e-2, atol=1e-2)

    print("KERNEL_OK")
</pallas_src>

<mosaic_0001>
module attributes {stable_mosaic.version = 11 : i64} {
  func.func @_ses_conv_kernel(%arg0: i32, %arg1: i32, %arg2: memref<1x1x8x640xbf16, #tpu.memory_space<vmem>>, %arg3: memref<3x8x392xbf16, #tpu.memory_space<vmem>>, %arg4: memref<8x1xf32, #tpu.memory_space<vmem>>, %arg5: memref<1x1x8x384xf32, #tpu.memory_space<vmem>>, %arg6: memref<392x384xbf16, #tpu.memory_space<vmem>>) attributes {dimension_semantics = [#tpu.dimension_semantics<parallel>, #tpu.dimension_semantics<parallel>], iteration_bounds = array<i64: 2, 3>, scalar_prefetch = 0 : i64, scratch_operands = 1 : i64, tpu.core_type = #tpu.core_type<tc>, window_params = [{transform_indices = @transform_0, window_bounds = array<i64: 1, 1, 8, 640>}, {pipeline_mode = #tpu.pipeline_mode<synchronous>, transform_indices = @transform_1, window_bounds = array<i64: 3, 8, 392>}, {pipeline_mode = #tpu.pipeline_mode<synchronous>, transform_indices = @transform_2, window_bounds = array<i64: 8, 1>}, {transform_indices = @transform_3, window_bounds = array<i64: 1, 1, 8, 384>}]} {
    %c0 = arith.constant 0 : index
    %c0_0 = arith.constant 0 : index
    %c0_1 = arith.constant 0 : index
    %c0_2 = arith.constant 0 : index
    %0 = vector.load %arg2[%c0, %c0_0, %c0_1, %c0_2] : memref<1x1x8x640xbf16, #tpu.memory_space<vmem>>, vector<1x1x8x384xbf16>
    %1 = vector.shape_cast %0 : vector<1x1x8x384xbf16> to vector<8x384xbf16>
    %c0_3 = arith.constant 0 : index
    %c0_4 = arith.constant 0 : index
    %2 = vector.load %arg6[%c0_3, %c0_4] : memref<392x384xbf16, #tpu.memory_space<vmem>>, vector<8x384xbf16>
    tpu.vector_store %arg6[%c0_3, %c0_4], %1 {strides = array<i32>} : memref<392x384xbf16, #tpu.memory_space<vmem>>, vector<8x384xbf16>,
    %c0_5 = arith.constant 0 : index
    %c0_6 = arith.constant 0 : index
    %c0_7 = arith.constant 0 : index
    %c1 = arith.constant 1 : index
    %3 = vector.load %arg2[%c0_5, %c0_6, %c0_7, %c1] : memref<1x1x8x640xbf16, #tpu.memory_space<vmem>>, vector<1x1x8x384xbf16>
    %4 = vector.shape_cast %3 : vector<1x1x8x384xbf16> to vector<8x384xbf16>
    %c8 = arith.constant 8 : index
    %c0_8 = arith.constant 0 : index
    %5 = vector.load %arg6[%c8, %c0_8] : memref<392x384xbf16, #tpu.memory_space<vmem>>, vector<8x384xbf16>
    tpu.vector_store %arg6[%c8, %c0_8], %4 {strides = array<i32>} : memref<392x384xbf16, #tpu.memory_space<vmem>>, vector<8x384xbf16>,
    %c0_9 = arith.constant 0 : index
    %c0_10 = arith.constant 0 : index
    %c0_11 = arith.constant 0 : index
    %c2 = arith.constant 2 : index
    %6 = vector.load %arg2[%c0_9, %c0_10, %c0_11, %c2] : memref<1x1x8x640xbf16, #tpu.memory_space<vmem>>, vector<1x1x8x384xbf16>
    %7 = vector.shape_cast %6 : vector<1x1x8x384xbf16> to vector<8x384xbf16>
    %c16 = arith.constant 16 : index
    %c0_12 = arith.constant 0 : index
    %8 = vector.load %arg6[%c16, %c0_12] : memref<392x384xbf16, #tpu.memory_space<vmem>>, vector<8x384xbf16>
    tpu.vector_store %arg6[%c16, %c0_12], %7 {strides = array<i32>} : memref<392x384xbf16, #tpu.memory_space<vmem>>, vector<8x384xbf16>,
    %c0_13 = arith.constant 0 : index
    %c0_14 = arith.constant 0 : index
    %c0_15 = arith.constant 0 : index
    %c3 = arith.constant 3 : index
    %9 = vector.load %arg2[%c0_13, %c0_14, %c0_15, %c3] : memref<1x1x8x640xbf16, #tpu.memory_space<vmem>>, vector<1x1x8x384xbf16>
    %10 = vector.shape_cast %9 : vector<1x1x8x384xbf16> to vector<8x384xbf16>
    %c24 = arith.constant 24 : index
    %c0_16 = arith.constant 0 : index
    %11 = vector.load %arg6[%c24, %c0_16] : memref<392x384xbf16, #tpu.memory_space<vmem>>, vector<8x384xbf16>
    tpu.vector_store %arg6[%c24, %c0_16], %10 {strides = array<i32>} : memref<392x384xbf16, #tpu.memory_space<vmem>>, vector<8x384xbf16>,
    %c0_17 = arith.constant 0 : index
    %c0_18 = arith.constant 0 : index
    %c0_19 = arith.constant 0 : index
    %c4 = arith.constant 4 : index
    %12 = vector.load %arg2[%c0_17, %c0_18, %c0_19, %c4] : memref<1x1x8x640xbf16, #tpu.memory_space<vmem>>, vector<1x1x8x384xbf16>
    %13 = vector.shape_cast %12 : vector<1x1x8x384xbf16> to vector<8x384xbf16>
    %c32 = arith.constant 32 : index
    %c0_20 = arith.constant 0 : index
    %14 = vector.load %arg6[%c32, %c0_20] : memref<392x384xbf16, #tpu.memory_space<vmem>>, vector<8x384xbf16>
    tpu.vector_store %arg6[%c32, %c0_20], %13 {strides = array<i32>} : memref<392x384xbf16, #tpu.memory_space<vmem>>, vector<8x384xbf16>,
    %c0_21 = arith.constant 0 : index
    %c0_22 = arith.constant 0 : index
    %c0_23 = arith.constant 0 : index
    %c5 = arith.constant 5 : index
    %15 = vector.load %arg2[%c0_21, %c0_22, %c0_23, %c5] : memref<1x1x8x640xbf16, #tpu.memory_space<vmem>>, vector<1x1x8x384xbf16>
    %16 = vector.shape_cast %15 : vector<1x1x8x384xbf16> to vector<8x384xbf16>
    %c40 = arith.constant 40 : index
    %c0_24 = arith.constant 0 : index
    %17 = vector.load %arg6[%c40, %c0_24] : memref<392x384xbf16, #tpu.memory_space<vmem>>, vector<8x384xbf16>
    tpu.vector_store %arg6[%c40, %c0_24], %16 {strides = array<i32>} : memref<392x384xbf16, #tpu.memory_space<vmem>>, vector<8x384xbf16>,
    %c0_25 = arith.constant 0 : index
    %c0_26 = arith.constant 0 : index
    %c0_27 = arith.constant 0 : index
    %c6 = arith.constant 6 : index
    %18 = vector.load %arg2[%c0_25, %c0_26, %c0_27, %c6] : memref<1x1x8x640xbf16, #tpu.memory_space<vmem>>, vector<1x1x8x384xbf16>
    %19 = vector.shape_cast %18 : vector<1x1x8x384xbf16> to vector<8x384xbf16>
    %c48 = arith.constant 48 : index
    %c0_28 = arith.constant 0 : index
    %20 = vector.load %arg6[%c48, %c0_28] : memref<392x384xbf16, #tpu.memory_space<vmem>>, vector<8x384xbf16>
    tpu.vector_store %arg6[%c48, %c0_28], %19 {strides = array<i32>} : memref<392x384xbf16, #tpu.memory_space<vmem>>, vector<8x384xbf16>,
    %c0_29 = arith.constant 0 : index
    %c0_30 = arith.constant 0 : index
    %c0_31 = arith.constant 0 : index
    %c22 = arith.constant 22 : index
    %21 = vector.load %arg2[%c0_29, %c0_30, %c0_31, %c22] : memref<1x1x8x640xbf16, #tpu.memory_space<vmem>>, vector<1x1x8x384xbf16>
    %22 = vector.shape_cast %21 : vector<1x1x8x384xbf16> to vector<8x384xbf16>
    %c56 = arith.constant 56 : index
    %c0_32 = arith.constant 0 : index
    %23 = vector.load %arg6[%c56, %c0_32] : memref<392x384xbf16, #tpu.memory_space<vmem>>, vector<8x384xbf16>
    tpu.vector_store %arg6[%c56, %c0_32], %22 {strides = array<i32>} : memref<392x384xbf16, #tpu.memory_space<vmem>>, vector<8x384xbf16>,
    %c0_33 = arith.constant 0 : index
    %c0_34 = arith.constant 0 : index
    %c0_35 = arith.constant 0 : index
    %c23 = arith.constant 23 : index
    %24 = vector.load %arg2[%c0_33, %c0_34, %c0_35, %c23] : memref<1x1x8x640xbf16, #tpu.memory_space<vmem>>, vector<1x1x8x384xbf16>
    %25 = vector.shape_cast %24 : vector<1x1x8x384xbf16> to vector<8x384xbf16>
    %c64 = arith.constant 64 : index
    %c0_36 = arith.constant 0 : index
    %26 = vector.load %arg6[%c64, %c0_36] : memref<392x384xbf16, #tpu.memory_space<vmem>>, vector<8x384xbf16>
    tpu.vector_store %arg6[%c64, %c0_36], %25 {strides = array<i32>} : memref<392x384xbf16, #tpu.memory_space<vmem>>, vector<8x384xbf16>,
    %c0_37 = arith.constant 0 : index
    %c0_38 = arith.constant 0 : index
    %c0_39 = arith.constant 0 : index
    %c24_40 = arith.constant 24 : index
    %27 = vector.load %arg2[%c0_37, %c0_38, %c0_39, %c24_40] : memref<1x1x8x640xbf16, #tpu.memory_space<vmem>>, vector<1x1x8x384xbf16>
    %28 = vector.shape_cast %27 : vector<1x1x8x384xbf16> to vector<8x384xbf16>
    %c72 = arith.constant 72 : index
    %c0_41 = arith.constant 0 : index
    %29 = vector.load %arg6[%c72, %c0_41] : memref<392x384xbf16, #tpu.memory_space<vmem>>, vector<8x384xbf16>
    tpu.vector_store %arg6[%c72, %c0_41], %28 {strides = array<i32>} : memref<392x384xbf16, #tpu.memory_space<vmem>>, vector<8x384xbf16>,
    %c0_42 = arith.constant 0 : index
    %c0_43 = arith.constant 0 : index
    %c0_44 = arith.constant 0 : index
    %c25 = arith.constant 25 : index
    %30 = vector.load %arg2[%c0_42, %c0_43, %c0_44, %c25] : memref<1x1x8x640xbf16, #tpu.memory_space<vmem>>, vector<1x1x8x384xbf16>
    %31 = vector.shape_cast %30 : vector<1x1x8x384xbf16> to vector<8x384xbf16>
    %c80 = arith.constant 80 : index
    %c0_45 = arith.constant 0 : index
    %32 = vector.load %arg6[%c80, %c0_45] : memref<392x384xbf16, #tpu.memory_space<vmem>>, vector<8x384xbf16>
    tpu.vector_store %arg6[%c80, %c0_45], %31 {strides = array<i32>} : memref<392x384xbf16, #tpu.memory_space<vmem>>, vector<8x384xbf16>,
    %c0_46 = arith.constant 0 : index
    %c0_47 = arith.constant 0 : index
    %c0_48 = arith.constant 0 : index
    %c26 = arith.constant 26 : index
    %33 = vector.load %arg2[%c0_46, %c0_47, %c0_48, %c26] : memref<1x1x8x640xbf16, #tpu.memory_space<vmem>>, vector<1x1x8x384xbf16>
    %34 = vector.shape_cast %33 : vector<1x1x8x384xbf16> to vector<8x384xbf16>
    %c88 = arith.constant 88 : index
    %c0_49 = arith.constant 0 : index
    %35 = vector.load %arg6[%c88, %c0_49] : memref<392x384xbf16, #tpu.memory_space<vmem>>, vector<8x384xbf16>
    tpu.vector_store %arg6[%c88, %c0_49], %34 {strides = array<i32>} : memref<392x384xbf16, #tpu.memory_space<vmem>>, vector<8x384xbf16>,
    %c0_50 = arith.constant 0 : index
    %c0_51 = arith.constant 0 : index
    %c0_52 = arith.constant 0 : index
    %c27 = arith.constant 27 : index
    %36 = vector.load %arg2[%c0_50, %c0_51, %c0_52, %c27] : memref<1x1x8x640xbf16, #tpu.memory_space<vmem>>, vector<1x1x8x384xbf16>
    %37 = vector.shape_cast %36 : vector<1x1x8x384xbf16> to vector<8x384xbf16>
    %c96 = arith.constant 96 : index
    %c0_53 = arith.constant 0 : index
    %38 = vector.load %arg6[%c96, %c0_53] : memref<392x384xbf16, #tpu.memory_space<vmem>>, vector<8x384xbf16>
    tpu.vector_store %arg6[%c96, %c0_53], %37 {strides = array<i32>} : memref<392x384xbf16, #tpu.memory_space<vmem>>, vector<8x384xbf16>,
    %c0_54 = arith.constant 0 : index
    %c0_55 = arith.constant 0 : index
    %c0_56 = arith.constant 0 : index
    %c28 = arith.constant 28 : index
    %39 = vector.load %arg2[%c0_54, %c0_55, %c0_56, %c28] : memref<1x1x8x640xbf16, #tpu.memory_space<vmem>>, vector<1x1x8x384xbf16>
    %40 = vector.shape_cast %39 : vector<1x1x8x384xbf16> to vector<8x384xbf16>
    %c104 = arith.constant 104 : index
    %c0_57 = arith.constant 0 : index
    %41 = vector.load %arg6[%c104, %c0_57] : memref<392x384xbf16, #tpu.memory_space<vmem>>, vector<8x384xbf16>
    tpu.vector_store %arg6[%c104, %c0_57], %40 {strides = array<i32>} : memref<392x384xbf16, #tpu.memory_space<vmem>>, vector<8x384xbf16>,
    %c0_58 = arith.constant 0 : index
    %c0_59 = arith.constant 0 : index
    %c0_60 = arith.constant 0 : index
    %c44 = arith.constant 44 : index
    %42 = vector.load %arg2[%c0_58, %c0_59, %c0_60, %c44] : memref<1x1x8x640xbf16, #tpu.memory_space<vmem>>, vector<1x1x8x384xbf16>
    %43 = vector.shape_cast %42 : vector<1x1x8x384xbf16> to vector<8x384xbf16>
    %c112 = arith.constant 112 : index
    %c0_61 = arith.constant 0 : index
    %44 = vector.load %arg6[%c112, %c0_61] : memref<392x384xbf16, #tpu.memory_space<vmem>>, vector<8x384xbf16>
    tpu.vector_store %arg6[%c112, %c0_61], %43 {strides = array<i32>} : memref<392x384xbf16, #tpu.memory_space<vmem>>, vector<8x384xbf16>,
    %c0_62 = arith.constant 0 : index
    %c0_63 = arith.constant 0 : index
    %c0_64 = arith.constant 0 : index
    %c45 = arith.constant 45 : index
    %45 = vector.load %arg2[%c0_62, %c0_63, %c0_64, %c45] : memref<1x1x8x640xbf16, #tpu.memory_space<vmem>>, vector<1x1x8x384xbf16>
    %46 = vector.shape_cast %45 : vector<1x1x8x384xbf16> to vector<8x384xbf16>
    %c120 = arith.constant 120 : index
    %c0_65 = arith.constant 0 : index
    %47 = vector.load %arg6[%c120, %c0_65] : memref<392x384xbf16, #tpu.memory_space<vmem>>, vector<8x384xbf16>
    tpu.vector_store %arg6[%c120, %c0_65], %46 {strides = array<i32>} : memref<392x384xbf16, #tpu.memory_space<vmem>>, vector<8x384xbf16>,
    %c0_66 = arith.constant 0 : index
    %c0_67 = arith.constant 0 : index
    %c0_68 = arith.constant 0 : index
    %c46 = arith.constant 46 : index
    %48 = vector.load %arg2[%c0_66, %c0_67, %c0_68, %c46] : memref<1x1x8x640xbf16, #tpu.memory_space<vmem>>, vector<1x1x8x384xbf16>
    %49 = vector.shape_cast %48 : vector<1x1x8x384xbf16> to vector<8x384xbf16>
    %c128 = arith.constant 128 : index
    %c0_69 = arith.constant 0 : index
    %50 = vector.load %arg6[%c128, %c0_69] : memref<392x384xbf16, #tpu.memory_space<vmem>>, vector<8x384xbf16>
    tpu.vector_store %arg6[%c128, %c0_69], %49 {strides = array<i32>} : memref<392x384xbf16, #tpu.memory_space<vmem>>, vector<8x384xbf16>,
    %c0_70 = arith.constant 0 : index
    %c0_71 = arith.constant 0 : index
    %c0_72 = arith.constant 0 : index
    %c47 = arith.constant 47 : index
    %51 = vector.load %arg2[%c0_70, %c0_71, %c0_72, %c47] : memref<1x1x8x640xbf16, #tpu.memory_space<vmem>>, vector<1x1x8x384xbf16>
    %52 = vector.shape_cast %51 : vector<1x1x8x384xbf16> to vector<8x384xbf16>
    %c136 = arith.constant 136 : index
    %c0_73 = arith.constant 0 : index
    %53 = vector.load %arg6[%c136, %c0_73] : memref<392x384xbf16, #tpu.memory_space<vmem>>, vector<8x384xbf16>
    tpu.vector_store %arg6[%c136, %c0_73], %52 {strides = array<i32>} : memref<392x384xbf16, #tpu.memory_space<vmem>>, vector<8x384xbf16>,
    %c0_74 = arith.constant 0 : index
    %c0_75 = arith.constant 0 : index
    %c0_76 = arith.constant 0 : index
    %c48_77 = arith.constant 48 : index
    %54 = vector.load %arg2[%c0_74, %c0_75, %c0_76, %c48_77] : memref<1x1x8x640xbf16, #tpu.memory_space<vmem>>, vector<1x1x8x384xbf16>
    %55 = vector.shape_cast %54 : vector<1x1x8x384xbf16> to vector<8x384xbf16>
    %c144 = arith.constant 144 : index
    %c0_78 = arith.constant 0 : index
    %56 = vector.load %arg6[%c144, %c0_78] : memref<392x384xbf16, #tpu.memory_space<vmem>>, vector<8x384xbf16>
    tpu.vector_store %arg6[%c144, %c0_78], %55 {strides = array<i32>} : memref<392x384xbf16, #tpu.memory_space<vmem>>, vector<8x384xbf16>,
    %c0_79 = arith.constant 0 : index
    %c0_80 = arith.constant 0 : index
    %c0_81 = arith.constant 0 : index
    %c49 = arith.constant 49 : index
    %57 = vector.load %arg2[%c0_79, %c0_80, %c0_81, %c49] : memref<1x1x8x640xbf16, #tpu.memory_space<vmem>>, vector<1x1x8x384xbf16>
    %58 = vector.shape_cast %57 : vector<1x1x8x384xbf16> to vector<8x384xbf16>
    %c152 = arith.constant 152 : index
    %c0_82 = arith.constant 0 : index
    %59 = vector.load %arg6[%c152, %c0_82] : memref<392x384xbf16, #tpu.memory_space<vmem>>, vector<8x384xbf16>
    tpu.vector_store %arg6[%c152, %c0_82], %58 {strides = array<i32>} : memref<392x384xbf16, #tpu.memory_space<vmem>>, vector<8x384xbf16>,
    %c0_83 = arith.constant 0 : index
    %c0_84 = arith.constant 0 : index
    %c0_85 = arith.constant 0 : index
    %c50 = arith.constant 50 : index
    %60 = vector.load %arg2[%c0_83, %c0_84, %c0_85, %c50] : memref<1x1x8x640xbf16, #tpu.memory_space<vmem>>, vector<1x1x8x384xbf16>
    %61 = vector.shape_cast %60 : vector<1x1x8x384xbf16> to vector<8x384xbf16>
    %c160 = arith.constant 160 : index
    %c0_86 = arith.constant 0 : index
    %62 = vector.load %arg6[%c160, %c0_86] : memref<392x384xbf16, #tpu.memory_space<vmem>>, vector<8x384xbf16>
    tpu.vector_store %arg6[%c160, %c0_86], %61 {strides = array<i32>} : memref<392x384xbf16, #tpu.memory_space<vmem>>, vector<8x384xbf16>,
    %c0_87 = arith.constant 0 : index
    %c0_88 = arith.constant 0 : index
    %c0_89 = arith.constant 0 : index
    %c66 = arith.constant 66 : index
    %63 = vector.load %arg2[%c0_87, %c0_88, %c0_89, %c66] : memref<1x1x8x640xbf16, #tpu.memory_space<vmem>>, vector<1x1x8x384xbf16>
    %64 = vector.shape_cast %63 : vector<1x1x8x384xbf16> to vector<8x384xbf16>
    %c168 = arith.constant 168 : index
    %c0_90 = arith.constant 0 : index
    %65 = vector.load %arg6[%c168, %c0_90] : memref<392x384xbf16, #tpu.memory_space<vmem>>, vector<8x384xbf16>
    tpu.vector_store %arg6[%c168, %c0_90], %64 {strides = array<i32>} : memref<392x384xbf16, #tpu.memory_space<vmem>>, vector<8x384xbf16>,
    %c0_91 = arith.constant 0 : index
    %c0_92 = arith.constant 0 : index
    %c0_93 = arith.constant 0 : index
    %c67 = arith.constant 67 : index
    %66 = vector.load %arg2[%c0_91, %c0_92, %c0_93, %c67] : memref<1x1x8x640xbf16, #tpu.memory_space<vmem>>, vector<1x1x8x384xbf16>
    %67 = vector.shape_cast %66 : vector<1x1x8x384xbf16> to vector<8x384xbf16>
    %c176 = arith.constant 176 : index
    %c0_94 = arith.constant 0 : index
    %68 = vector.load %arg6[%c176, %c0_94] : memref<392x384xbf16, #tpu.memory_space<vmem>>, vector<8x384xbf16>
    tpu.vector_store %arg6[%c176, %c0_94], %67 {strides = array<i32>} : memref<392x384xbf16, #tpu.memory_space<vmem>>, vector<8x384xbf16>,
    %c0_95 = arith.constant 0 : index
    %c0_96 = arith.constant 0 : index
    %c0_97 = arith.constant 0 : index
    %c68 = arith.constant 68 : index
    %69 = vector.load %arg2[%c0_95, %c0_96, %c0_97, %c68] : memref<1x1x8x640xbf16, #tpu.memory_space<vmem>>, vector<1x1x8x384xbf16>
    %70 = vector.shape_cast %69 : vector<1x1x8x384xbf16> to vector<8x384xbf16>
    %c184 = arith.constant 184 : index
    %c0_98 = arith.constant 0 : index
    %71 = vector.load %arg6[%c184, %c0_98] : memref<392x384xbf16, #tpu.memory_space<vmem>>, vector<8x384xbf16>
    tpu.vector_store %arg6[%c184, %c0_98], %70 {strides = array<i32>} : memref<392x384xbf16, #tpu.memory_space<vmem>>, vector<8x384xbf16>,
    %c0_99 = arith.constant 0 : index
    %c0_100 = arith.constant 0 : index
    %c0_101 = arith.constant 0 : index
    %c69 = arith.constant 69 : index
    %72 = vector.load %arg2[%c0_99, %c0_100, %c0_101, %c69] : memref<1x1x8x640xbf16, #tpu.memory_space<vmem>>, vector<1x1x8x384xbf16>
    %73 = vector.shape_cast %72 : vector<1x1x8x384xbf16> to vector<8x384xbf16>
    %c192 = arith.constant 192 : index
    %c0_102 = arith.constant 0 : index
    %74 = vector.load %arg6[%c192, %c0_102] : memref<392x384xbf16, #tpu.memory_space<vmem>>, vector<8x384xbf16>
    tpu.vector_store %arg6[%c192, %c0_102], %73 {strides = array<i32>} : memref<392x384xbf16, #tpu.memory_space<vmem>>, vector<8x384xbf16>,
    %c0_103 = arith.constant 0 : index
    %c0_104 = arith.constant 0 : index
    %c0_105 = arith.constant 0 : index
    %c70 = arith.constant 70 : index
    %75 = vector.load %arg2[%c0_103, %c0_104, %c0_105, %c70] : memref<1x1x8x640xbf16, #tpu.memory_space<vmem>>, vector<1x1x8x384xbf16>
    %76 = vector.shape_cast %75 : vector<1x1x8x384xbf16> to vector<8x384xbf16>
    %c200 = arith.constant 200 : index
    %c0_106 = arith.constant 0 : index
    %77 = vector.load %arg6[%c200, %c0_106] : memref<392x384xbf16, #tpu.memory_space<vmem>>, vector<8x384xbf16>
    tpu.vector_store %arg6[%c200, %c0_106], %76 {strides = array<i32>} : memref<392x384xbf16, #tpu.memory_space<vmem>>, vector<8x384xbf16>,
    %c0_107 = arith.constant 0 : index
    %c0_108 = arith.constant 0 : index
    %c0_109 = arith.constant 0 : index
    %c71 = arith.constant 71 : index
    %78 = vector.load %arg2[%c0_107, %c0_108, %c0_109, %c71] : memref<1x1x8x640xbf16, #tpu.memory_space<vmem>>, vector<1x1x8x384xbf16>
    %79 = vector.shape_cast %78 : vector<1x1x8x384xbf16> to vector<8x384xbf16>
    %c208 = arith.constant 208 : index
    %c0_110 = arith.constant 0 : index
    %80 = vector.load %arg6[%c208, %c0_110] : memref<392x384xbf16, #tpu.memory_space<vmem>>, vector<8x384xbf16>
    tpu.vector_store %arg6[%c208, %c0_110], %79 {strides = array<i32>} : memref<392x384xbf16, #tpu.memory_space<vmem>>, vector<8x384xbf16>,
    %c0_111 = arith.constant 0 : index
    %c0_112 = arith.constant 0 : index
    %c0_113 = arith.constant 0 : index
    %c72_114 = arith.constant 72 : index
    %81 = vector.load %arg2[%c0_111, %c0_112, %c0_113, %c72_114] : memref<1x1x8x640xbf16, #tpu.memory_space<vmem>>, vector<1x1x8x384xbf16>
    %82 = vector.shape_cast %81 : vector<1x1x8x384xbf16> to vector<8x384xbf16>
    %c216 = arith.constant 216 : index
    %c0_115 = arith.constant 0 : index
    %83 = vector.load %arg6[%c216, %c0_115] : memref<392x384xbf16, #tpu.memory_space<vmem>>, vector<8x384xbf16>
    tpu.vector_store %arg6[%c216, %c0_115], %82 {strides = array<i32>} : memref<392x384xbf16, #tpu.memory_space<vmem>>, vector<8x384xbf16>,
    %c0_116 = arith.constant 0 : index
    %c0_117 = arith.constant 0 : index
    %c0_118 = arith.constant 0 : index
    %c88_119 = arith.constant 88 : index
    %84 = vector.load %arg2[%c0_116, %c0_117, %c0_118, %c88_119] : memref<1x1x8x640xbf16, #tpu.memory_space<vmem>>, vector<1x1x8x384xbf16>
    %85 = vector.shape_cast %84 : vector<1x1x8x384xbf16> to vector<8x384xbf16>
    %c224 = arith.constant 224 : index
    %c0_120 = arith.constant 0 : index
    %86 = vector.load %arg6[%c224, %c0_120] : memref<392x384xbf16, #tpu.memory_space<vmem>>, vector<8x384xbf16>
    tpu.vector_store %arg6[%c224, %c0_120], %85 {strides = array<i32>} : memref<392x384xbf16, #tpu.memory_space<vmem>>, vector<8x384xbf16>,
    %c0_121 = arith.constant 0 : index
    %c0_122 = arith.constant 0 : index
    %c0_123 = arith.constant 0 : index
    %c89 = arith.constant 89 : index
    %87 = vector.load %arg2[%c0_121, %c0_122, %c0_123, %c89] : memref<1x1x8x640xbf16, #tpu.memory_space<vmem>>, vector<1x1x8x384xbf16>
    %88 = vector.shape_cast %87 : vector<1x1x8x384xbf16> to vector<8x384xbf16>
    %c232 = arith.constant 232 : index
    %c0_124 = arith.constant 0 : index
    %89 = vector.load %arg6[%c232, %c0_124] : memref<392x384xbf16, #tpu.memory_space<vmem>>, vector<8x384xbf16>
    tpu.vector_store %arg6[%c232, %c0_124], %88 {strides = array<i32>} : memref<392x384xbf16, #tpu.memory_space<vmem>>, vector<8x384xbf16>,
    %c0_125 = arith.constant 0 : index
    %c0_126 = arith.constant 0 : index
    %c0_127 = arith.constant 0 : index
    %c90 = arith.constant 90 : index
    %90 = vector.load %arg2[%c0_125, %c0_126, %c0_127, %c90] : memref<1x1x8x640xbf16, #tpu.memory_space<vmem>>, vector<1x1x8x384xbf16>
    %91 = vector.shape_cast %90 : vector<1x1x8x384xbf16> to vector<8x384xbf16>
    %c240 = arith.constant 240 : index
    %c0_128 = arith.constant 0 : index
    %92 = vector.load %arg6[%c240, %c0_128] : memref<392x384xbf16, #tpu.memory_space<vmem>>, vector<8x384xbf16>
    tpu.vector_store %arg6[%c240, %c0_128], %91 {strides = array<i32>} : memref<392x384xbf16, #tpu.memory_space<vmem>>, vector<8x384xbf16>,
    %c0_129 = arith.constant 0 : index
    %c0_130 = arith.constant 0 : index
    %c0_131 = arith.constant 0 : index
    %c91 = arith.constant 91 : index
    %93 = vector.load %arg2[%c0_129, %c0_130, %c0_131, %c91] : memref<1x1x8x640xbf16, #tpu.memory_space<vmem>>, vector<1x1x8x384xbf16>
    %94 = vector.shape_cast %93 : vector<1x1x8x384xbf16> to vector<8x384xbf16>
    %c248 = arith.constant 248 : index
    %c0_132 = arith.constant 0 : index
    %95 = vector.load %arg6[%c248, %c0_132] : memref<392x384xbf16, #tpu.memory_space<vmem>>, vector<8x384xbf16>
    tpu.vector_store %arg6[%c248, %c0_132], %94 {strides = array<i32>} : memref<392x384xbf16, #tpu.memory_space<vmem>>, vector<8x384xbf16>,
    %c0_133 = arith.constant 0 : index
    %c0_134 = arith.constant 0 : index
    %c0_135 = arith.constant 0 : index
    %c92 = arith.constant 92 : index
    %96 = vector.load %arg2[%c0_133, %c0_134, %c0_135, %c92] : memref<1x1x8x640xbf16, #tpu.memory_space<vmem>>, vector<1x1x8x384xbf16>
    %97 = vector.shape_cast %96 : vector<1x1x8x384xbf16> to vector<8x384xbf16>
    %c256 = arith.constant 256 : index
    %c0_136 = arith.constant 0 : index
    %98 = vector.load %arg6[%c256, %c0_136] : memref<392x384xbf16, #tpu.memory_space<vmem>>, vector<8x384xbf16>
    tpu.vector_store %arg6[%c256, %c0_136], %97 {strides = array<i32>} : memref<392x384xbf16, #tpu.memory_space<vmem>>, vector<8x384xbf16>,
    %c0_137 = arith.constant 0 : index
    %c0_138 = arith.constant 0 : index
    %c0_139 = arith.constant 0 : index
    %c93 = arith.constant 93 : index
    %99 = vector.load %arg2[%c0_137, %c0_138, %c0_139, %c93] : memref<1x1x8x640xbf16, #tpu.memory_space<vmem>>, vector<1x1x8x384xbf16>
    %100 = vector.shape_cast %99 : vector<1x1x8x384xbf16> to vector<8x384xbf16>
    %c264 = arith.constant 264 : index
    %c0_140 = arith.constant 0 : index
    %101 = vector.load %arg6[%c264, %c0_140] : memref<392x384xbf16, #tpu.memory_space<vmem>>, vector<8x384xbf16>
    tpu.vector_store %arg6[%c264, %c0_140], %100 {strides = array<i32>} : memref<392x384xbf16, #tpu.memory_space<vmem>>, vector<8x384xbf16>,
    %c0_141 = arith.constant 0 : index
    %c0_142 = arith.constant 0 : index
    %c0_143 = arith.constant 0 : index
    %c94 = arith.constant 94 : index
    %102 = vector.load %arg2[%c0_141, %c0_142, %c0_143, %c94] : memref<1x1x8x640xbf16, #tpu.memory_space<vmem>>, vector<1x1x8x384xbf16>
    %103 = vector.shape_cast %102 : vector<1x1x8x384xbf16> to vector<8x384xbf16>
    %c272 = arith.constant 272 : index
    %c0_144 = arith.constant 0 : index
    %104 = vector.load %arg6[%c272, %c0_144] : memref<392x384xbf16, #tpu.memory_space<vmem>>, vector<8x384xbf16>
    tpu.vector_store %arg6[%c272, %c0_144], %103 {strides = array<i32>} : memref<392x384xbf16, #tpu.memory_space<vmem>>, vector<8x384xbf16>,
    %c0_145 = arith.constant 0 : index
    %c0_146 = arith.constant 0 : index
    %c0_147 = arith.constant 0 : index
    %c110 = arith.constant 110 : index
    %105 = vector.load %arg2[%c0_145, %c0_146, %c0_147, %c110] : memref<1x1x8x640xbf16, #tpu.memory_space<vmem>>, vector<1x1x8x384xbf16>
    %106 = vector.shape_cast %105 : vector<1x1x8x384xbf16> to vector<8x384xbf16>
    %c280 = arith.constant 280 : index
    %c0_148 = arith.constant 0 : index
    %107 = vector.load %arg6[%c280, %c0_148] : memref<392x384xbf16, #tpu.memory_space<vmem>>, vector<8x384xbf16>
    tpu.vector_store %arg6[%c280, %c0_148], %106 {strides = array<i32>} : memref<392x384xbf16, #tpu.memory_space<vmem>>, vector<8x384xbf16>,
    %c0_149 = arith.constant 0 : index
    %c0_150 = arith.constant 0 : index
    %c0_151 = arith.constant 0 : index
    %c111 = arith.constant 111 : index
    %108 = vector.load %arg2[%c0_149, %c0_150, %c0_151, %c111] : memref<1x1x8x640xbf16, #tpu.memory_space<vmem>>, vector<1x1x8x384xbf16>
    %109 = vector.shape_cast %108 : vector<1x1x8x384xbf16> to vector<8x384xbf16>
    %c288 = arith.constant 288 : index
    %c0_152 = arith.constant 0 : index
    %110 = vector.load %arg6[%c288, %c0_152] : memref<392x384xbf16, #tpu.memory_space<vmem>>, vector<8x384xbf16>
    tpu.vector_store %arg6[%c288, %c0_152], %109 {strides = array<i32>} : memref<392x384xbf16, #tpu.memory_space<vmem>>, vector<8x384xbf16>,
    %c0_153 = arith.constant 0 : index
    %c0_154 = arith.constant 0 : index
    %c0_155 = arith.constant 0 : index
    %c112_156 = arith.constant 112 : index
    %111 = vector.load %arg2[%c0_153, %c0_154, %c0_155, %c112_156] : memref<1x1x8x640xbf16, #tpu.memory_space<vmem>>, vector<1x1x8x384xbf16>
    %112 = vector.shape_cast %111 : vector<1x1x8x384xbf16> to vector<8x384xbf16>
    %c296 = arith.constant 296 : index
    %c0_157 = arith.constant 0 : index
    %113 = vector.load %arg6[%c296, %c0_157] : memref<392x384xbf16, #tpu.memory_space<vmem>>, vector<8x384xbf16>
    tpu.vector_store %arg6[%c296, %c0_157], %112 {strides = array<i32>} : memref<392x384xbf16, #tpu.memory_space<vmem>>, vector<8x384xbf16>,
    %c0_158 = arith.constant 0 : index
    %c0_159 = arith.constant 0 : index
    %c0_160 = arith.constant 0 : index
    %c113 = arith.constant 113 : index
    %114 = vector.load %arg2[%c0_158, %c0_159, %c0_160, %c113] : memref<1x1x8x640xbf16, #tpu.memory_space<vmem>>, vector<1x1x8x384xbf16>
    %115 = vector.shape_cast %114 : vector<1x1x8x384xbf16> to vector<8x384xbf16>
    %c304 = arith.constant 304 : index
    %c0_161 = arith.constant 0 : index
    %116 = vector.load %arg6[%c304, %c0_161] : memref<392x384xbf16, #tpu.memory_space<vmem>>, vector<8x384xbf16>
    tpu.vector_store %arg6[%c304, %c0_161], %115 {strides = array<i32>} : memref<392x384xbf16, #tpu.memory_space<vmem>>, vector<8x384xbf16>,
    %c0_162 = arith.constant 0 : index
    %c0_163 = arith.constant 0 : index
    %c0_164 = arith.constant 0 : index
    %c114 = arith.constant 114 : index
    %117 = vector.load %arg2[%c0_162, %c0_163, %c0_164, %c114] : memref<1x1x8x640xbf16, #tpu.memory_space<vmem>>, vector<1x1x8x384xbf16>
    %118 = vector.shape_cast %117 : vector<1x1x8x384xbf16> to vector<8x384xbf16>
    %c312 = arith.constant 312 : index
    %c0_165 = arith.constant 0 : index
    %119 = vector.load %arg6[%c312, %c0_165] : memref<392x384xbf16, #tpu.memory_space<vmem>>, vector<8x384xbf16>
    tpu.vector_store %arg6[%c312, %c0_165], %118 {strides = array<i32>} : memref<392x384xbf16, #tpu.memory_space<vmem>>, vector<8x384xbf16>,
    %c0_166 = arith.constant 0 : index
    %c0_167 = arith.constant 0 : index
    %c0_168 = arith.constant 0 : index
    %c115 = arith.constant 115 : index
    %120 = vector.load %arg2[%c0_166, %c0_167, %c0_168, %c115] : memref<1x1x8x640xbf16, #tpu.memory_space<vmem>>, vector<1x1x8x384xbf16>
    %121 = vector.shape_cast %120 : vector<1x1x8x384xbf16> to vector<8x384xbf16>
    %c320 = arith.constant 320 : index
    %c0_169 = arith.constant 0 : index
    %122 = vector.load %arg6[%c320, %c0_169] : memref<392x384xbf16, #tpu.memory_space<vmem>>, vector<8x384xbf16>
    tpu.vector_store %arg6[%c320, %c0_169], %121 {strides = array<i32>} : memref<392x384xbf16, #tpu.memory_space<vmem>>, vector<8x384xbf16>,
    %c0_170 = arith.constant 0 : index
    %c0_171 = arith.constant 0 : index
    %c0_172 = arith.constant 0 : index
    %c116 = arith.constant 116 : index
    %123 = vector.load %arg2[%c0_170, %c0_171, %c0_172, %c116] : memref<1x1x8x640xbf16, #tpu.memory_space<vmem>>, vector<1x1x8x384xbf16>
    %124 = vector.shape_cast %123 : vector<1x1x8x384xbf16> to vector<8x384xbf16>
    %c328 = arith.constant 328 : index
    %c0_173 = arith.constant 0 : index
    %125 = vector.load %arg6[%c328, %c0_173] : memref<392x384xbf16, #tpu.memory_space<vmem>>, vector<8x384xbf16>
    tpu.vector_store %arg6[%c328, %c0_173], %124 {strides = array<i32>} : memref<392x384xbf16, #tpu.memory_space<vmem>>, vector<8x384xbf16>,
    %c0_174 = arith.constant 0 : index
    %c0_175 = arith.constant 0 : index
    %c0_176 = arith.constant 0 : index
    %c132 = arith.constant 132 : index
    %126 = vector.load %arg2[%c0_174, %c0_175, %c0_176, %c132] : memref<1x1x8x640xbf16, #tpu.memory_space<vmem>>, vector<1x1x8x384xbf16>
    %127 = vector.shape_cast %126 : vector<1x1x8x384xbf16> to vector<8x384xbf16>
    %c336 = arith.constant 336 : index
    %c0_177 = arith.constant 0 : index
    %128 = vector.load %arg6[%c336, %c0_177] : memref<392x384xbf16, #tpu.memory_space<vmem>>, vector<8x384xbf16>
    tpu.vector_store %arg6[%c336, %c0_177], %127 {strides = array<i32>} : memref<392x384xbf16, #tpu.memory_space<vmem>>, vector<8x384xbf16>,
    %c0_178 = arith.constant 0 : index
    %c0_179 = arith.constant 0 : index
    %c0_180 = arith.constant 0 : index
    %c133 = arith.constant 133 : index
    %129 = vector.load %arg2[%c0_178, %c0_179, %c0_180, %c133] : memref<1x1x8x640xbf16, #tpu.memory_space<vmem>>, vector<1x1x8x384xbf16>
    %130 = vector.shape_cast %129 : vector<1x1x8x384xbf16> to vector<8x384xbf16>
    %c344 = arith.constant 344 : index
    %c0_181 = arith.constant 0 : index
    %131 = vector.load %arg6[%c344, %c0_181] : memref<392x384xbf16, #tpu.memory_space<vmem>>, vector<8x384xbf16>
    tpu.vector_store %arg6[%c344, %c0_181], %130 {strides = array<i32>} : memref<392x384xbf16, #tpu.memory_space<vmem>>, vector<8x384xbf16>,
    %c0_182 = arith.constant 0 : index
    %c0_183 = arith.constant 0 : index
    %c0_184 = arith.constant 0 : index
    %c134 = arith.constant 134 : index
    %132 = vector.load %arg2[%c0_182, %c0_183, %c0_184, %c134] : memref<1x1x8x640xbf16, #tpu.memory_space<vmem>>, vector<1x1x8x384xbf16>
    %133 = vector.shape_cast %132 : vector<1x1x8x384xbf16> to vector<8x384xbf16>
    %c352 = arith.constant 352 : index
    %c0_185 = arith.constant 0 : index
    %134 = vector.load %arg6[%c352, %c0_185] : memref<392x384xbf16, #tpu.memory_space<vmem>>, vector<8x384xbf16>
    tpu.vector_store %arg6[%c352, %c0_185], %133 {strides = array<i32>} : memref<392x384xbf16, #tpu.memory_space<vmem>>, vector<8x384xbf16>,
    %c0_186 = arith.constant 0 : index
    %c0_187 = arith.constant 0 : index
    %c0_188 = arith.constant 0 : index
    %c135 = arith.constant 135 : index
    %135 = vector.load %arg2[%c0_186, %c0_187, %c0_188, %c135] : memref<1x1x8x640xbf16, #tpu.memory_space<vmem>>, vector<1x1x8x384xbf16>
    %136 = vector.shape_cast %135 : vector<1x1x8x384xbf16> to vector<8x384xbf16>
    %c360 = arith.constant 360 : index
    %c0_189 = arith.constant 0 : index
    %137 = vector.load %arg6[%c360, %c0_189] : memref<392x384xbf16, #tpu.memory_space<vmem>>, vector<8x384xbf16>
    tpu.vector_store %arg6[%c360, %c0_189], %136 {strides = array<i32>} : memref<392x384xbf16, #tpu.memory_space<vmem>>, vector<8x384xbf16>,
    %c0_190 = arith.constant 0 : index
    %c0_191 = arith.constant 0 : index
    %c0_192 = arith.constant 0 : index
    %c136_193 = arith.constant 136 : index
    %138 = vector.load %arg2[%c0_190, %c0_191, %c0_192, %c136_193] : memref<1x1x8x640xbf16, #tpu.memory_space<vmem>>, vector<1x1x8x384xbf16>
    %139 = vector.shape_cast %138 : vector<1x1x8x384xbf16> to vector<8x384xbf16>
    %c368 = arith.constant 368 : index
    %c0_194 = arith.constant 0 : index
    %140 = vector.load %arg6[%c368, %c0_194] : memref<392x384xbf16, #tpu.memory_space<vmem>>, vector<8x384xbf16>
    tpu.vector_store %arg6[%c368, %c0_194], %139 {strides = array<i32>} : memref<392x384xbf16, #tpu.memory_space<vmem>>, vector<8x384xbf16>,
    %c0_195 = arith.constant 0 : index
    %c0_196 = arith.constant 0 : index
    %c0_197 = arith.constant 0 : index
    %c137 = arith.constant 137 : index
    %141 = vector.load %arg2[%c0_195, %c0_196, %c0_197, %c137] : memref<1x1x8x640xbf16, #tpu.memory_space<vmem>>, vector<1x1x8x384xbf16>
    %142 = vector.shape_cast %141 : vector<1x1x8x384xbf16> to vector<8x384xbf16>
    %c376 = arith.constant 376 : index
    %c0_198 = arith.constant 0 : index
    %143 = vector.load %arg6[%c376, %c0_198] : memref<392x384xbf16, #tpu.memory_space<vmem>>, vector<8x384xbf16>
    tpu.vector_store %arg6[%c376, %c0_198], %142 {strides = array<i32>} : memref<392x384xbf16, #tpu.memory_space<vmem>>, vector<8x384xbf16>,
    %c0_199 = arith.constant 0 : index
    %c0_200 = arith.constant 0 : index
    %c0_201 = arith.constant 0 : index
    %c138 = arith.constant 138 : index
    %144 = vector.load %arg2[%c0_199, %c0_200, %c0_201, %c138] : memref<1x1x8x640xbf16, #tpu.memory_space<vmem>>, vector<1x1x8x384xbf16>
    %145 = vector.shape_cast %144 : vector<1x1x8x384xbf16> to vector<8x384xbf16>
    %c384 = arith.constant 384 : index
    %c0_202 = arith.constant 0 : index
    %146 = vector.load %arg6[%c384, %c0_202] : memref<392x384xbf16, #tpu.memory_space<vmem>>, vector<8x384xbf16>
    tpu.vector_store %arg6[%c384, %c0_202], %145 {strides = array<i32>} : memref<392x384xbf16, #tpu.memory_space<vmem>>, vector<8x384xbf16>,
    %147 = arith.index_cast %arg1 : i32 to index
    %c0_203 = arith.constant 0 : index
    %c0_204 = arith.constant 0 : index
    %148 = vector.load %arg3[%147, %c0_203, %c0_204] : memref<3x8x392xbf16, #tpu.memory_space<vmem>>, vector<1x8x392xbf16>
    %149 = vector.shape_cast %148 : vector<1x8x392xbf16> to vector<8x392xbf16>
    %c0_205 = arith.constant 0 : index
    %c0_206 = arith.constant 0 : index
    %150 = vector.load %arg6[%c0_205, %c0_206] : memref<392x384xbf16, #tpu.memory_space<vmem>>, vector<392x384xbf16>
    %cst = arith.constant dense<0.000000e+00> : vector<8x384xf32>
    %151 = tpu.matmul %149, %150, %cst {dimension_numbers = #tpu.dot_dimension_numbers<[1], [0], [0], [1], [0, 0, 1, 1], [], []>} : vector<8x392xbf16>, vector<392x384xbf16>, vector<8x384xf32> -> vector<8x384xf32>
    %c0_207 = arith.constant 0 : index
    %c0_208 = arith.constant 0 : index
    %152 = vector.load %arg4[%c0_207, %c0_208] : memref<8x1xf32, #tpu.memory_space<vmem>>, vector<8x1xf32>
    %153 = vector.broadcast %152 : vector<8x1xf32> to vector<8x384xf32>
    %154 = arith.addf %151, %153 : vector<8x384xf32>
    %cst_209 = arith.constant 0.000000e+00 : f32
    %155 = vector.broadcast %cst_209 : f32 to vector<8x384xf32>
    %156 = arith.maximumf %154, %155 : vector<8x384xf32>
    %c0_210 = arith.constant 0 : index
    %c0_211 = arith.constant 0 : index
    %c0_212 = arith.constant 0 : index
    %c0_213 = arith.constant 0 : index
    %157 = vector.load %arg5[%c0_210, %c0_211, %c0_212, %c0_213] : memref<1x1x8x384xf32, #tpu.memory_space<vmem>>, vector<1x1x8x384xf32>
    %158 = vector.shape_cast %157 : vector<1x1x8x384xf32> to vector<8x384xf32>
    %159 = vector.shape_cast %156 : vector<8x384xf32> to vector<1x1x8x384xf32>
    tpu.vector_store %arg5[%c0_210, %c0_211, %c0_212, %c0_213], %159 {strides = array<i32>} : memref<1x1x8x384xf32, #tpu.memory_space<vmem>>, vector<1x1x8x384xf32>,
    return
  }
  func.func @transform_0(%arg0: i32, %arg1: i32) -> (i32, i32, i32, i32) {
    %c0_i32 = arith.constant 0 : i32
    %c0_i32_0 = arith.constant 0 : i32
    %c0_i32_1 = arith.constant 0 : i32
    return %arg0, %arg1, %c0_i32, %c0_i32_0 : i32, i32, i32, i32
  }
  func.func @transform_1(%arg0: i32, %arg1: i32) -> (i32, i32, i32) {
    %c0_i32 = arith.constant 0 : i32
    %c0_i32_0 = arith.constant 0 : i32
    %c0_i32_1 = arith.constant 0 : i32
    %c0_i32_2 = arith.constant 0 : i32
    return %c0_i32, %c0_i32_0, %c0_i32_1 : i32, i32, i32
  }
  func.func @transform_2(%arg0: i32, %arg1: i32) -> (i32, i32) {
    %c0_i32 = arith.constant 0 : i32
    %c0_i32_0 = arith.constant 0 : i32
    %c0_i32_1 = arith.constant 0 : i32
    return %c0_i32, %c0_i32_0 : i32, i32
  }
  func.func @transform_3(%arg0: i32, %arg1: i32) -> (i32, i32, i32, i32) {
    %c0_i32 = arith.constant 0 : i32
    %c0_i32_0 = arith.constant 0 : i32
    %c0_i32_1 = arith.constant 0 : i32
    return %arg0, %arg1, %c0_i32, %c0_i32_0 : i32, i32, i32, i32
  }
}

</mosaic_0001>

<bundles_post_ra>
// kernel: tpu_custom_call.1
= control target key start
LH: loop header
LB: loop body
LE: loop exit
PB: predicated region body
PF: predicated region fallthrough
CT: control target
= control target key end

     0   :  { %s2893_s0 = inlined_call_operand.hbm [shape: bf16[2,3,8,640], index: 0, kind: input, shape index: {}]   ;;  %s2894_s1 = inlined_call_operand.hbm [shape: bf16[3,8,392], index: 1, kind: input, shape index: {}]   ;;  %s2895_s2 = inlined_call_operand.vmem [shape: f32[8,1], index: 2, kind: input, shape index: {}]   ;;  %s2896_s3 = inlined_call_operand.hbm [shape: f32[2,3,8,384], index: 3, kind: output, shape index: {}]  }
   0x1   :  { %2904 = sst [smem:[#allocation15_spill]] %s2894_s1 }
   0x2   :  { %8 = vsyncpa [#allocation4], 0 }
   0x3   :  { %10 = vsyncpa [#allocation4 + $0x1], 0 }
   0x4   :  { %11 = vsyncpa [#allocation7], 0 }
   0x5   :  { %12 = vsyncpa [#allocation5], 0 }
   0x6   :  { %14 = vsyncpa [#allocation5 + $0x1], 0  ;;  %s2430_s12 = smov 0   ;;  %s2432_s13 = smov 0  }
   0x7   :  { %s2434_s14 = smov 0   ;;  %s2436_s15 = smov 0  }
   0x8   :  { %s2438_s16 = smov 0   ;;  %s2440_s17 = smov 0  }
   0x9   :  { %s2442_s18 = smov 0   ;;  %s2444_s19 = smov 0  }
   0xa LB: > { %2905 = sst [smem:[#allocation12_spill]] %s2349_s17  ;;  %s1899_s20 = sadd.s32 4294967295, %s2357_s19   ;;  %s2357_s19 = sphi %s2444_s19, %s20_s19   ;;  %s2353_s18 = sphi %s2442_s18, %s2929_s18   ;;  %s2349_s17 = sphi %s2440_s17, %s2923_s17   ;;  %s2345_s16 = sphi %s2438_s16, %s2928_s16   ;;  %s2341_s15 = sphi %s2436_s15, %s2922_s15   ;;  %s2337_s14 = sphi %s2434_s14, %s2927_s14   ;;  %s2333_s13 = sphi %s2432_s13, %s2926_s13   ;;  %s2329_s12 = sphi %s2430_s12, %s2925_s12  }
   0xb   : > { %s1900_s21 = sadd.s32 4294967294, %s2357_s19   ;;  %p54_p0 = scmp.ne.s32.totalorder %s2333_s13, %s2329_s12 }
   0xc   : > { %p2474_p1 = scmp.eq.s32.totalorder %s1899_s20, 0  ;;  %p2478_p2 = scmp.eq.s32.totalorder %s1899_s20, 5 }
   0xd   : > { %p128_p3 = scmp.eq.s32.totalorder %s1900_s21, 5  ;;  %p1901_p5 = scmp.ge.s32.totalorder %s2357_s19, 1 }
   0xe   : > { %s2906_s22 = scalar_select %p2474_p1, 1, 0 }
   0xf   : > { %s2907_s23 = scalar_select %p2478_p2, 1, 0 }
  0x10   : > { %p2484_p4 = por %p2474_p1, %p54_p0  ;;  %p2489_p6 = por %p128_p3, %p54_p0 }
  0x11   : > { %p135_p7 = scmp.lt.s32.totalorder %s2357_s19, 7  ;;  %s2359_s27 = smov [#allocation6]  }
  0x12   : > { %s2908_s24 = scalar_select %p2484_p4, 1, 0 }
  0x13   : > { %s2909_s25 = scalar_select %p2489_p6, 1, 0 }
  0x14   : > { %p2494_p8 = pnand %p1901_p5, %p135_p7  ;;  %s147_s28 = sshll.u32 %s2359_s27, 4  ;;  %s148_s28 = int_to_ptr.vmem [resolvable:$true] %s147_s28 }
  0x15   : > { %s2912_s1 = sld [smem:[#allocation15_spill]] }
  0x16   : > { %s2910_s26 = scalar_select %p2494_p8, 1, 0 }
  0x17   : > { %p2038_p9 = pneg %p2494_p8 }
  0x19   : > { %p2502_p10 = pnand %p2038_p9, %p2474_p1 }
  0x1b   : > { %s2197_s5 = scalar_lea.hbm %s2912_s1, 768  ;;  %p2199_p12 = pneg %p2502_p10 }
  0x1c   : > { %p2198_p11 = scmp.ne.s32.totalorder %s2912_s1, %s2197_s5  ;;  %p2204_p3 = scmp.lt.u32.totalorder %s2197_s5, %s2912_s1 }
  0x1e   : > { %p2200_p13 = pnand %p2199_p12, %p2198_p11 }
  0x20   : > { %p2201_p0 = pneg %p2200_p13 }
  0x22   : > { %p2206_p5 = pnand %p2204_p3, %p2201_p0 }
  0x24   : > { %2209 = shalt.err (!%p2206_p5)
}
  0x25   : > { %s2210_s10 = scalar_lea.vmem %s148_s28, 768  ;;  %p2218_p1 = scmp.lt.s32.totalorder %s148_s28, %s148_s28 }
  0x26   : > { %p2211_p7 = scmp.ne.s32.totalorder %s148_s28, %s2210_s10  ;;  %p2219_p4 = scmp.lt.s32.totalorder %s2210_s10, %s2210_s10 }
  0x28   : > { %p2213_p9 = pnand %p2211_p7, %p2199_p12  ;;  %p2220_p8 = por %p2219_p4, %p2218_p1 }
  0x2a   : > { %p2214_p6 = pneg %p2213_p9 }
  0x2c   : > { %p2221_p2 = pnand %p2220_p8, %p2214_p6 }
  0x2e   : > { %2224 = shalt.err (!%p2221_p2)
}
  0x2f   : > { %s2360_s11 = smov 256   ;;  %s2361_s20 = smov 16  }
  0x30   : > { %2041 = dma.hbm_to_vmem [thread:$0]  (!%p2502_p10), %s2912_s1, 768, %s148_s28, [#allocation7], %s2360_s11, %s2360_s11, %s2361_s20  }
  0x31   : > { %s29_s30 = sadd.s32 1, %s2349_s17  ;;  %s32_s4 = sadd.s32 1, %s2353_s18 }
  0x32   : > { %p30_p1 = scmp.ge.s32.totalorder %s29_s30, 3  ;;  %s41_s5 = sadd.s32 1, %s2337_s14 }
  0x33   : > { %p48_p2 = scmp.ne.s32.totalorder %s2337_s14, %s2333_s13  ;;  %p49_p4 = scmp.eq.s32.totalorder %s2357_s19, 0 }
  0x34   : > { %s2931_s30 = smov (%p30_p1, %s29_s30), 0  ;;  %s2933_s4 = smov (!%p30_p1, %s32_s4), %s2353_s18 }
  0x35   : > { %2913 = sst [smem:[#allocation13_spill]] %s2931_s30  ;;  %s37_s6 = ssub.s32 %s2349_s17, %s2931_s30 }
  0x36   : > { %p34_p6 = scmp.ge.s32.totalorder %s2933_s4, 2  ;;  %p2914_p8 = scmp.ne.s32.totalorder %s2907_s23, 0 }
  0x37   : > { %p50_p10 = por %p49_p4, %p48_p2  ;;  %p2051_p12 = scmp.lt.s32.totalorder %s2357_s19, 6 }
  0x38   : > { %p2535_p11 = por %p2914_p8, %p48_p2  ;;  %s2935_s4 = smov (%p34_p6, %s2933_s4), 0 }
  0x39   : > { %2916 = sst [smem:[#allocation14_spill]] %s2935_s4  ;;  %s164_s28 = sand.u32 1, %s2337_s14  }
  0x3a   : > { %s2024_s7 = smul.u32 5, %s2349_s17  ;;  %s36_s8 = ssub.s32 %s2353_s18, %s2935_s4 }
  0x3b   : > { %s38_s9 = sor.u32 %s37_s6, %s36_s8  ;;  %s2023_s10 = smul.u32 20, %s164_s28 }
  0x3c   : > { %p39_p13 = scmp.eq.s32.totalorder %s38_s9, 0  ;;  %s2025_s11 = smul.u32 15, %s2353_s18 }
  0x3d   : > { %p2547_p0 = pnand %p2051_p12, %p50_p10  ;;  %s168_s27 = scalar_lea.vmem [#allocation3], %s2023_s10 }
  0x3e   : > { %s2552_s23 = scalar_select %p39_p13, %s2337_s14, %s41_s5  }
  0x3f   : > { %s174_s21 = sadd.s32 %s2025_s11, %s2024_s7  ;;  %s178_s1 = sshll.u32 %s168_s27, 4  ;;  %s2554_s1 = int_to_ptr.vmem [resolvable:$true] %s178_s1 }
  0x40   : > { %s1904_s30 = sshll.u32 %s174_s21, 6  ;;  %s165_s8 = scalar_lea.sflag [#allocation4], %s164_s28 }
  0x41   : > { %s2559_s6 = scalar_lea.hbm %s2893_s0, %s1904_s30  ;;  %p2227_p5 = pneg %p2547_p0 }
  0x42   : > { %s2225_s9 = scalar_lea.hbm %s2559_s6, 320  ;;  %s2230_s10 = scalar_lea.hbm %s2893_s0, 1920 }
  0x43   : > { %p2226_p3 = scmp.ne.s32.totalorder %s2559_s6, %s2225_s9  ;;  %p2231_p1 = scmp.lt.u32.totalorder %s2559_s6, %s2893_s0 }
  0x44   : > { %p2232_p2 = scmp.lt.u32.totalorder %s2230_s10, %s2225_s9  ;;  %p2234_p6 = scmp.lt.u32.totalorder %s2225_s9, %s2559_s6 }
  0x45   : > { %p2228_p7 = pnand %p2227_p5, %p2226_p3 }
  0x46   : > { %p2233_p4 = por %p2232_p2, %p2231_p1 }
  0x47   : > { %p2229_p9 = pneg %p2228_p7 }
  0x48   : > { %p2235_p8 = por %p2234_p6, %p2233_p4 }
  0x4a   : > { %p2236_p10 = pnand %p2235_p8, %p2229_p9 }
  0x4c   : > { %2239 = shalt.err (!%p2236_p10)
}
  0x4d   : > { %s2240_s4 = scalar_lea.vmem %s2554_s1, 320  ;;  %s2362_s28 = smov [#allocation3]  }
  0x4e   : > { %p2241_p12 = scmp.ne.s32.totalorder %s2554_s1, %s2240_s4  ;;  %s2245_s11 = sshll.u32 %s2362_s28, 4  ;;  %s2246_s11 = int_to_ptr.vmem [resolvable:$false] %s2245_s11 }
  0x4f   : > { %s2247_s21 = scalar_lea.vmem %s2246_s11, 640  ;;  %p2248_p7 = scmp.lt.s32.totalorder %s2554_s1, %s2246_s11 }
  0x50   : > { %p2243_p13 = pnand %p2241_p12, %p2227_p5  ;;  %p2249_p1 = scmp.lt.s32.totalorder %s2247_s21, %s2240_s4 }
  0x52   : > { %p2244_p3 = pneg %p2243_p13  ;;  %p2250_p2 = por %p2249_p1, %p2248_p7 }
  0x54   : > { %p2251_p4 = pnand %p2250_p2, %p2244_p3 }
  0x56   : > { %2254 = shalt.err (!%p2251_p4)
}
  0x57   : > { %2045 = dma.hbm_to_vmem [thread:$0]  (!%p2547_p0), %s2559_s6, 320, %s2554_s1, %s165_s8  }
  0x58   : > { %p2918_p9 = scmp.ne.s32.totalorder %s2910_s26, 0 }
  0x59   : > { %s2589_s27 = sand.u32 (!%p2918_p9), 1, %s2333_s13   ;;  %p2919_p5 = scmp.ne.s32.totalorder (!%p2918_p9), %s2908_s24, 0 }
  0x5a   : > { %187 = sbr.rel (%p2918_p9) target bundleno = 650 (0x28a), region = 32  ;;  %s190_s5 = scalar_lea.sflag (!%p2918_p9), [#allocation4], %s2589_s27 }
  0x5b   : > { %s2026_s9 = smul.u32 (!%p2918_p9), 20, %s2589_s27 }
  0x5d   : > { %s2593_s7 = scalar_lea.vmem (!%p2918_p9), [#allocation3], %s2026_s9 }
  0x61   : > { %2316 = dma.done.wait (%p2919_p5), %s190_s5, 320  }
  0x62   : > { %2318 = vsyncadd (%p2919_p5), %s190_s5, 4294966976  ;;  %p2920_p0 = scmp.ne.s32.totalorder %s2906_s22, 0 }
  0x64   : > { %2320 = dma.done.wait (%p2920_p0), [#allocation7], 768  }
  0x65   : > { %2322 = vsyncadd (%p2920_p0), [#allocation7], 4294966528  ;;  %v2604_v0 = vld [vmem:[%s2593_s7] sm:$0xff]  ;;  %s2363_s1 = smov 126   ;;  %s2364_s26 = smov 127   ;;  %v2610_v2 = vld [vmem:[%s2593_s7 + $0x8] sm:$0xff] }
  0x66   : > { %248 = vrot.lane.b32.xlu1 %v2604_v0, %s2363_s1  ;;  %229 = vrot.lane.b32.xlu0 %v2604_v0, %s2364_s26  ;;  %v222_v1 = vld [vmem:[%s2593_s7 + $0x8] sm:$0xf]  ;;  %s2365_s22 = smov 125   ;;  %s2366_s24 = smov 124   ;;  %vm235_vm0 = vcmask 1043456   ;;  %vm255_vm1 = vcmask 1031168  }
  0x67   : > { %224 = vst [vmem:[#allocation2 + $0x8] sm:$0xf] %v222_v1  ;;  %s2367_s20 = smov 123   ;;  %s2368_s6 = smov 122   ;;  %vm237_vm2 = vcmask 1039360   ;;  %vm273_vm3 = vcmask 1022976  }
  0x68   : > { %s2369_s8 = smov 106   ;;  %s2370_s10 = smov 105   ;;  %vm291_vm4 = vcmask 1014784   ;;  %v2395_v30 = vmov 0   ;;  %vm309_vm5 = vcmask 1006592   ;;  %vm327_vm6 = vcmask 998400  }
  0x69   : > { %s2371_s17 = smov 104   ;;  %s2372_s30 = smov 103   ;;  %2167 = vset.pattern.permute.xlu0 %v2395_v30  ;;  %vm345_vm7 = vcmask 867328   ;;  %vm363_vm8 = vcmask 859136   ;;  %vm381_vm9 = vcmask 850944   ;;  %vm399_vm10 = vcmask 842752  }
  0x6a   : > { %250 = vrot.lane.b32.xlu1 %v2610_v2, %s2363_s1  ;;  %231 = vrot.lane.b32.xlu0 %v2610_v2, %s2364_s26  ;;  %s2373_s4 = smov 102   ;;  %s2374_s28 = smov 101   ;;  %vm417_vm11 = vcmask 834560   ;;  %vm435_vm12 = vcmask 826368   ;;  %vm453_vm13 = vcmask 818176   ;;  %vm471_vm14 = vcmask 687104  }
  0x6b   : > { %s2375_s11 = smov 100   ;;  %s2376_s21 = smov 84   ;;  %vm489_vm15 = vcmask 678912  }
  0x6c   : > { %s2377_s9 = smov 83   ;;  %s2378_s5 = smov 82  }
  0x6d   : > { %s2379_s1 = smov 81   ;;  %s2380_s26 = smov 80  }
  0x6e   : > { %268 = vrot.lane.b32.xlu1 %v2610_v2, %s2365_s22  ;;  %266 = vrot.lane.b32.xlu0 %v2604_v0, %s2365_s22  ;;  %s2381_s22 = smov 79  }
  0x72   : > { %286 = vrot.lane.b32.xlu1 %v2610_v2, %s2366_s24  ;;  %284 = vrot.lane.b32.xlu0 %v2604_v0, %s2366_s24 }
  0x76   : > { %304 = vrot.lane.b32.xlu1 %v2610_v2, %s2367_s20  ;;  %302 = vrot.lane.b32.xlu0 %v2604_v0, %s2367_s20 }
  0x7a   : > { %322 = vrot.lane.b32.xlu1 %v2610_v2, %s2368_s6  ;;  %320 = vrot.lane.b32.xlu0 %v2604_v0, %s2368_s6 }
  0x7e   : > { %340 = vrot.lane.b32.xlu1 %v2610_v2, %s2369_s8  ;;  %338 = vrot.lane.b32.xlu0 %v2604_v0, %s2369_s8  ;;  %s2382_s8 = smov 78  }
  0x82   : > { %358 = vrot.lane.b32.xlu1 %v2610_v2, %s2370_s10  ;;  %356 = vrot.lane.b32.xlu0 %v2604_v0, %s2370_s10  ;;  %s2383_s10 = smov 62  }
  0x86   : > { %376 = vrot.lane.b32.xlu1 %v2610_v2, %s2371_s17  ;;  %374 = vrot.lane.b32.xlu0 %v2604_v0, %s2371_s17  ;;  %s2384_s17 = smov 61  }
  0x8a   : > { %394 = vrot.lane.b32.xlu1 %v2610_v2, %s2372_s30  ;;  %392 = vrot.lane.b32.xlu0 %v2604_v0, %s2372_s30  ;;  %s2385_s30 = smov 60  }
  0x8e   : > { %412 = vrot.lane.b32.xlu1 %v2610_v2, %s2373_s4  ;;  %410 = vrot.lane.b32.xlu0 %v2604_v0, %s2373_s4  ;;  %s2386_s4 = smov 59  }
  0x92   : > { %430 = vrot.lane.b32.xlu1 %v2610_v2, %s2374_s28  ;;  %428 = vrot.lane.b32.xlu0 %v2604_v0, %s2374_s28  ;;  %s2387_s28 = smov 58  }
  0x96   : > { %448 = vrot.lane.b32.xlu1 %v2610_v2, %s2375_s11  ;;  %446 = vrot.lane.b32.xlu0 %v2604_v0, %s2375_s11  ;;  %s2388_s11 = smov 57  }
  0x9a   : > { %466 = vrot.lane.b32.xlu1 %v2610_v2, %s2376_s21  ;;  %464 = vrot.lane.b32.xlu0 %v2604_v0, %s2376_s21  ;;  %s2389_s21 = smov 56  }
  0x9e   : > { %484 = vrot.lane.b32.xlu1 %v2610_v2, %s2377_s9  ;;  %482 = vrot.lane.b32.xlu0 %v2604_v0, %s2377_s9  ;;  %s2390_s9 = smov 40  }
  0xa2   : > { %502 = vrot.lane.b32.xlu1 %v2610_v2, %s2378_s5  ;;  %500 = vrot.lane.b32.xlu0 %v2604_v0, %s2378_s5  ;;  %s2391_s5 = smov 39  }
  0xa6   : > { %520 = vrot.lane.b32.xlu1 %v2610_v2, %s2379_s1  ;;  %518 = vrot.lane.b32.xlu0 %v2604_v0, %s2379_s1  ;;  %s2392_s1 = smov 38  }
  0xaa   : > { %538 = vrot.lane.b32.xlu1 %v2610_v2, %s2380_s26  ;;  %536 = vrot.lane.b32.xlu0 %v2604_v0, %s2380_s26  ;;  %s1994_s26 = sshll.u32 %s2341_s15, 4 }
  0xae   : > { %556 = vrot.lane.b32.xlu1 %v2610_v2, %s2381_s22  ;;  %554 = vrot.lane.b32.xlu0 %v2604_v0, %s2381_s22  ;;  %s2677_s22 = scalar_lea.vmem [#allocation6], %s1994_s26 }
  0xaf   : > { %v2680_v8 = vld [vmem:[%s2677_s22] sm:$0xff] }
  0xb0   : > { %v1910_v12 = vcombine.high %v2680_v8, %v2680_v8 }
  0xb2   : > { %574 = vrot.lane.b32.xlu1 %v2610_v2, %s2382_s8  ;;  %572 = vrot.lane.b32.xlu0 %v2604_v0, %s2382_s8  ;;  %s2393_s8 = smov 37  }
  0xb3   : > { %1729 = vmatprep.mubr.bf16.mxu1 %v1910_v12  ;;  %1647 = vmatprep.mubr.bf16.mxu0 %v1910_v12 }
  0xb6   : > { %592 = vrot.lane.b32.xlu1 %v2610_v2, %s2383_s10  ;;  %590 = vrot.lane.b32.xlu0 %v2604_v0, %s2383_s10  ;;  %s2394_s10 = smov 36  }
  0xba   : > { %610 = vrot.lane.b32.xlu1 %v2610_v2, %s2384_s17  ;;  %608 = vrot.lane.b32.xlu0 %v2604_v0, %s2384_s17  ;;  %s2396_s17 = smov 35  }
  0xbe   : > { %628 = vrot.lane.b32.xlu1 %v2610_v2, %s2385_s30  ;;  %626 = vrot.lane.b32.xlu0 %v2604_v0, %s2385_s30  ;;  %s2397_s30 = smov 34  }
  0xc2   : > { %646 = vrot.lane.b32.xlu1 %v2610_v2, %s2386_s4  ;;  %644 = vrot.lane.b32.xlu0 %v2604_v0, %s2386_s4  ;;  %s2398_s4 = smov 18  }
  0xc6   : > { %664 = vrot.lane.b32.xlu1 %v2610_v2, %s2387_s28  ;;  %662 = vrot.lane.b32.xlu0 %v2604_v0, %s2387_s28  ;;  %s2399_s28 = smov 17  }
  0xca   : > { %682 = vrot.lane.b32.xlu1 %v2610_v2, %s2388_s11  ;;  %680 = vrot.lane.b32.xlu0 %v2604_v0, %s2388_s11  ;;  %s2400_s11 = smov 16  }
  0xce   : > { %700 = vrot.lane.b32.xlu1 %v2610_v2, %s2389_s21  ;;  %698 = vrot.lane.b32.xlu0 %v2604_v0, %s2389_s21  ;;  %s2401_s21 = smov 15  }
  0xd2   : > { %718 = vrot.lane.b32.xlu1 %v2610_v2, %s2390_s9  ;;  %716 = vrot.lane.b32.xlu0 %v2604_v0, %s2390_s9  ;;  %s2402_s9 = smov 14  }
  0xd6   : > { %736 = vrot.lane.b32.xlu1 %v2610_v2, %s2391_s5  ;;  %734 = vrot.lane.b32.xlu0 %v2604_v0, %s2391_s5  ;;  %s2403_s5 = smov 13  }
  0xd8   : > { %v249_v3 = vpop.permute.xlu1 %248  ;;  %v230_v4 = vpop.permute.xlu0 %229 }
  0xd9   : > { %v233_v5 = vrot.slane %v230_v4, 4  ;;  %v252_v9 = vrot.slane %v249_v3, 4 }
  0xda   : > { %754 = vrot.lane.b32.xlu1 %v2610_v2, %s2392_s1  ;;  %752 = vrot.lane.b32.xlu0 %v2604_v0, %s2392_s1  ;;  %s2404_s1 = smov 12  }
  0xdc   : > { %v251_v6 = vpop.permute.xlu1 %250  ;;  %v232_v7 = vpop.permute.xlu0 %231 }
  0xdd   : > { %v253_v10 = vrot.slane %v251_v6, 4  ;;  %v234_v11 = vrot.slane %v232_v7, 4 }
  0xde   : > { %772 = vrot.lane.b32.xlu1 %v2610_v2, %s2393_s8  ;;  %770 = vrot.lane.b32.xlu0 %v2604_v0, %s2393_s8 }
  0xdf   : > { %v254_v13 = vsel %vm235_vm0, %v252_v9, %v253_v10  ;;  %v257_v14 = vsel %vm255_vm1, %v251_v6, %v253_v10  ;;  %v236_v15 = vsel %vm235_vm0, %v233_v5, %v234_v11  ;;  %v239_v16 = vsel %vm237_vm2, %v232_v7, %v234_v11 }
  0xe0   : > { %v256_v17 = vsel %vm255_vm1, %v249_v3, %v254_v13  ;;  %261 = vst [vmem:[#allocation2 + $0x20] sm:$0xf] %v257_v14  ;;  %v238_v18 = vsel %vm237_vm2, %v230_v4, %v236_v15  ;;  %243 = vst [vmem:[#allocation2 + $0x14] sm:$0xf] %v239_v16  ;;  %v269_v19 = vpop.permute.xlu1 %268  ;;  %v267_v20 = vpop.permute.xlu0 %266  ;;  %vm507_vm1 = vcmask 670720   ;;  %vm525_vm2 = vcmask 662528  }
  0xe1   : > { %v271_v21 = vrot.slane %v269_v19, 4  ;;  %v270_v22 = vrot.slane %v267_v20, 4  ;;  %v1914_v23 = vcombine.high %v2604_v0, %v238_v18  ;;  %v1913_v24 = vcombine.low %v2604_v0, %v238_v18 }
  0xe2   : > { %790 = vrot.lane.b32.xlu1 %v2610_v2, %s2394_s10  ;;  %788 = vrot.lane.b32.xlu0 %v2604_v0, %s2394_s10  ;;  %s2028_s10 = smul.u32 3, %s2341_s15 }
  0xe3   : > { %v275_v25 = vsel %vm273_vm3, %v269_v19, %v271_v21  ;;  %v272_v26 = vsel %vm235_vm0, %v270_v22, %v271_v21  ;;  %1615 = vmatprep.subr.bf16.mxu0 %v1914_v23 }
  0xe4   : > { %279 = vst [vmem:[#allocation2 + $0x2c] sm:$0xf] %v275_v25  ;;  %v274_v27 = vsel %vm273_vm3, %v267_v20, %v272_v26  ;;  %v287_v28 = vpop.permute.xlu1 %286  ;;  %v285_v29 = vpop.permute.xlu0 %284  ;;  %1616 = vmatpush1.bf16.msra.mxu0 %v1913_v24  ;;  %vm543_vm3 = vcmask 654336  }
  0xe5   : > { %v289_v31 = vrot.slane %v287_v28, 4  ;;  %v288_v32 = vrot.slane %v285_v29, 4  ;;  %v1917_v33 = vcombine.high %v256_v17, %v274_v27  ;;  %v1916_v34 = vcombine.low %v256_v17, %v274_v27 }
  0xe6   : > { %808 = vrot.lane.b32.xlu1 %v2610_v2, %s2396_s17  ;;  %806 = vrot.lane.b32.xlu0 %v2604_v0, %s2396_s17  ;;  %s2029_s17 = smul.u32 9, %s2345_s16 }
  0xe7   : > { %v293_v35 = vsel %vm291_vm4, %v287_v28, %v289_v31  ;;  %v290_v36 = vsel %vm235_vm0, %v288_v32, %v289_v31  ;;  %1617 = vmatprep.subr.bf16.mxu0 %v1917_v33 }
  0xe8   : > { %297 = vst [vmem:[#allocation2 + $0x38] sm:$0xf] %v293_v35  ;;  %v292_v37 = vsel %vm291_vm4, %v285_v29, %v290_v36  ;;  %v305_v38 = vpop.permute.xlu1 %304  ;;  %v303_v39 = vpop.permute.xlu0 %302  ;;  %1618 = vmatpush1.bf16.msra.mxu0 %v1916_v34 }
  0xe9   : > { %v307_v40 = vrot.slane %v305_v38, 4  ;;  %v306_v41 = vrot.slane %v303_v39, 4 }
  0xea   : > { %826 = vrot.lane.b32.xlu1 %v2610_v2, %s2397_s30  ;;  %824 = vrot.lane.b32.xlu0 %v2604_v0, %s2397_s30  ;;  %s1796_s30 = sadd.s32 %s2029_s17, %s2028_s10 }
  0xeb   : > { %v311_v42 = vsel %vm309_vm5, %v305_v38, %v307_v40  ;;  %v308_v43 = vsel %vm235_vm0, %v306_v41, %v307_v40  ;;  %v2733_v41 = vld [vmem:[%s2593_s7 + $0xc] sm:$0xff] }
  0xec   : > { %315 = vst [vmem:[#allocation2 + $0x44] sm:$0xf] %v311_v42  ;;  %v310_v44 = vsel %vm309_vm5, %v303_v39, %v308_v43  ;;  %v323_v45 = vpop.permute.xlu1 %322  ;;  %v321_v46 = vpop.permute.xlu0 %320  ;;  %v2736_v42 = vld [vmem:[%s2593_s7 + $0x4] sm:$0xff]  ;;  %s2405_s7 = smov 121  }
  0xed   : > { %v325_v47 = vrot.slane %v323_v45, 4  ;;  %v324_v48 = vrot.slane %v321_v46, 4  ;;  %v1920_v49 = vcombine.high %v292_v37, %v310_v44  ;;  %v1919_v50 = vcombine.low %v292_v37, %v310_v44 }
  0xee   : > { %844 = vrot.lane.b32.xlu1 %v2610_v2, %s2398_s4  ;;  %842 = vrot.lane.b32.xlu0 %v2604_v0, %s2398_s4 }
  0xef   : > { %v329_v51 = vsel %vm327_vm6, %v323_v45, %v325_v47  ;;  %v326_v52 = vsel %vm235_vm0, %v324_v48, %v325_v47  ;;  %1619 = vmatprep.subr.bf16.mxu0 %v1920_v49 }
  0xf0   : > { %333 = vst [vmem:[#allocation2 + $0x50] sm:$0xf] %v329_v51  ;;  %v328_v53 = vsel %vm327_vm6, %v321_v46, %v326_v52  ;;  %v341_v54 = vpop.permute.xlu1 %340  ;;  %v339_v55 = vpop.permute.xlu0 %338  ;;  %1620 = vmatpush1.bf16.msra.mxu0 %v1919_v50 }
  0xf1   : > { %v343_v56 = vrot.slane %v341_v54, 4  ;;  %v342_v57 = vrot.slane %v339_v55, 4 }
  0xf2   : > { %862 = vrot.lane.b32.xlu1 %v2610_v2, %s2399_s28  ;;  %860 = vrot.lane.b32.xlu0 %v2604_v0, %s2399_s28  ;;  %s1991_s28 = sshll.u32 %s1796_s30, 7 }
  0xf3   : > { %v347_v58 = vsel %vm345_vm7, %v341_v54, %v343_v56  ;;  %v344_v59 = vsel %vm235_vm0, %v342_v57, %v343_v56 }
  0xf4   : > { %351 = vst [vmem:[#allocation2 + $0x5c] sm:$0xf] %v347_v58  ;;  %v346_v60 = vsel %vm345_vm7, %v339_v55, %v344_v59  ;;  %v359_v61 = vpop.permute.xlu1 %358  ;;  %v357_v62 = vpop.permute.xlu0 %356  ;;  %vm561_vm7 = vcmask 646144  }
  0xf5   : > { %v361_v63 = vrot.slane %v359_v61, 4  ;;  %v360_v1 = vrot.slane %v357_v62, 4  ;;  %v1923_v3 = vcombine.high %v328_v53, %v346_v60  ;;  %v1922_v4 = vcombine.low %v328_v53, %v346_v60 }
  0xf6   : > { %880 = vrot.lane.b32.xlu1 %v2610_v2, %s2400_s11  ;;  %878 = vrot.lane.b32.xlu0 %v2604_v0, %s2400_s11 }
  0xf7   : > { %v365_v5 = vsel %vm363_vm8, %v359_v61, %v361_v63  ;;  %v362_v6 = vsel %vm235_vm0, %v360_v1, %v361_v63  ;;  %1621 = vmatprep.subr.bf16.mxu0 %v1923_v3 }
  0xf8   : > { %369 = vst [vmem:[#allocation2 + $0x68] sm:$0xf] %v365_v5  ;;  %v364_v7 = vsel %vm363_vm8, %v357_v62, %v362_v6  ;;  %v377_v9 = vpop.permute.xlu1 %376  ;;  %v375_v10 = vpop.permute.xlu0 %374  ;;  %1622 = vmatpush1.bf16.msra.mxu0 %v1922_v4  ;;  %vm579_vm8 = vcmask 637952  }
  0xf9   : > { %v379_v11 = vrot.slane %v377_v9, 4  ;;  %v378_v12 = vrot.slane %v375_v10, 4 }
  0xfa   : > { %898 = vrot.lane.b32.xlu1 %v2610_v2, %s2401_s21  ;;  %896 = vrot.lane.b32.xlu0 %v2604_v0, %s2401_s21  ;;  %s2839_s21 = scalar_lea.hbm %s2896_s3, %s1991_s28 }
  0xfb   : > { %v383_v13 = vsel %vm381_vm9, %v377_v9, %v379_v11  ;;  %v380_v14 = vsel %vm235_vm0, %v378_v12, %v379_v11 }
  0xfc   : > { %387 = vst [vmem:[#allocation2 + $0x74] sm:$0xf] %v383_v13  ;;  %v382_v15 = vsel %vm381_vm9, %v375_v10, %v380_v14  ;;  %v395_v16 = vpop.permute.xlu1 %394  ;;  %v393_v17 = vpop.permute.xlu0 %392  ;;  %vm597_vm9 = vcmask 506880  }
  0xfd   : > { %v397_v18 = vrot.slane %v395_v16, 4  ;;  %v396_v19 = vrot.slane %v393_v17, 4  ;;  %v1926_v20 = vcombine.high %v364_v7, %v382_v15  ;;  %v1925_v21 = vcombine.low %v364_v7, %v382_v15 }
  0xfe   : > { %916 = vrot.lane.b32.xlu1 %v2610_v2, %s2402_s9  ;;  %914 = vrot.lane.b32.xlu0 %v2604_v0, %s2402_s9  ;;  %s1784_s9 = scalar_lea.sflag [#allocation5], %s2589_s27 }
  0xff   : > { %v401_v22 = vsel %vm399_vm10, %v395_v16, %v397_v18  ;;  %v398_v23 = vsel %vm235_vm0, %v396_v19, %v397_v18  ;;  %1623 = vmatprep.subr.bf16.mxu0 %v1926_v20 }
 0x100   : > { %405 = vst [vmem:[#allocation2 + $0x80] sm:$0xf] %v401_v22  ;;  %v400_v24 = vsel %vm399_vm10, %v393_v17, %v398_v23  ;;  %v413_v25 = vpop.permute.xlu1 %412  ;;  %v411_v26 = vpop.permute.xlu0 %410  ;;  %1624 = vmatpush1.bf16.msra.mxu0 %v1925_v21  ;;  %vm615_vm10 = vcmask 498688  }
 0x101   : > { %v415_v27 = vrot.slane %v413_v25, 4  ;;  %v414_v28 = vrot.slane %v411_v26, 4 }
 0x102   : > { %934 = vrot.lane.b32.xlu1 %v2610_v2, %s2403_s5  ;;  %932 = vrot.lane.b32.xlu0 %v2604_v0, %s2403_s5 }
 0x103   : > { %v419_v29 = vsel %vm417_vm11, %v413_v25, %v415_v27  ;;  %v416_v31 = vsel %vm235_vm0, %v414_v28, %v415_v27 }
 0x104   : > { %423 = vst [vmem:[#allocation2 + $0x8c] sm:$0xf] %v419_v29  ;;  %v418_v32 = vsel %vm417_vm11, %v411_v26, %v416_v31  ;;  %v431_v33 = vpop.permute.xlu1 %430  ;;  %v429_v34 = vpop.permute.xlu0 %428  ;;  %vm633_vm11 = vcmask 490496  }
 0x105   : > { %v433_v35 = vrot.slane %v431_v33, 4  ;;  %v432_v36 = vrot.slane %v429_v34, 4  ;;  %v1929_v37 = vcombine.high %v400_v24, %v418_v32  ;;  %v1928_v38 = vcombine.low %v400_v24, %v418_v32 }
 0x106   : > { %952 = vrot.lane.b32.xlu1 %v2610_v2, %s2404_s1  ;;  %950 = vrot.lane.b32.xlu0 %v2604_v0, %s2404_s1  ;;  %s2409_s1 = smov [#allocation8]  }
 0x107   : > { %v437_v39 = vsel %vm435_vm12, %v431_v33, %v433_v35  ;;  %v434_v40 = vsel %vm235_vm0, %v432_v36, %v433_v35  ;;  %1625 = vmatprep.subr.bf16.mxu0 %v1929_v37 }
 0x108   : > { %441 = vst [vmem:[#allocation2 + $0x98] sm:$0xf] %v437_v39  ;;  %v436_v43 = vsel %vm435_vm12, %v429_v34, %v434_v40  ;;  %v449_v44 = vpop.permute.xlu1 %448  ;;  %v447_v45 = vpop.permute.xlu0 %446  ;;  %1626 = vmatpush1.bf16.msra.mxu0 %v1928_v38  ;;  %v2169_v40 = vld [vmem:[#allocation2 + $0x8] ss:$12 sps:$4 sm:$0xff]   ;;  %vm651_vm12 = vcmask 482304  }
 0x109   : > { %v451_v46 = vrot.slane %v449_v44, 4  ;;  %v450_v2 = vrot.slane %v447_v45, 4 }
 0x10a   : > { %970 = vrot.lane.b32.xlu1 %v2733_v41, %s2366_s24  ;;  %968 = vrot.lane.b32.xlu0 %v2736_v42, %s2366_s24  ;;  %s2406_s24 = smov 120  }
 0x10b   : > { %v455_v0 = vsel %vm453_vm13, %v449_v44, %v451_v46  ;;  %v452_v47 = vsel %vm235_vm0, %v450_v2, %v451_v46 }
 0x10c   : > { %459 = vst [vmem:[#allocation2 + $0xa4] sm:$0xf] %v455_v0  ;;  %v454_v48 = vsel %vm453_vm13, %v447_v45, %v452_v47  ;;  %v467_v49 = vpop.permute.xlu1 %466  ;;  %v465_v50 = vpop.permute.xlu0 %464  ;;  %vm669_vm13 = vcmask 474112  }
 0x10d   : > { %v469_v51 = vrot.slane %v467_v49, 4  ;;  %v468_v52 = vrot.slane %v465_v50, 4  ;;  %v1932_v53 = vcombine.high %v436_v43, %v454_v48  ;;  %v1931_v54 = vcombine.low %v436_v43, %v454_v48 }
 0x10e   : > { %987 = vrot.lane.b32.xlu1 %v2733_v41, %s2367_s20  ;;  %985 = vrot.lane.b32.xlu0 %v2736_v42, %s2367_s20  ;;  %s2407_s20 = smov 119  }
 0x10f   : > { %v473_v55 = vsel %vm471_vm14, %v467_v49, %v469_v51  ;;  %v470_v56 = vsel %vm235_vm0, %v468_v52, %v469_v51  ;;  %1627 = vmatprep.subr.bf16.mxu0 %v1932_v53 }
 0x110   : > { %477 = vst [vmem:[#allocation2 + $0xb0] sm:$0xf] %v473_v55  ;;  %v472_v57 = vsel %vm471_vm14, %v465_v50, %v470_v56  ;;  %v485_v58 = vpop.permute.xlu1 %484  ;;  %v483_v59 = vpop.permute.xlu0 %482  ;;  %1628 = vmatpush1.bf16.msra.mxu0 %v1931_v54  ;;  %vm687_vm14 = vcmask 465920  }
 0x111   : > { %v487_v60 = vrot.slane %v485_v58, 4  ;;  %v486_v61 = vrot.slane %v483_v59, 4 }
 0x112   : > { %1004 = vrot.lane.b32.xlu1 %v2733_v41, %s2368_s6  ;;  %1002 = vrot.lane.b32.xlu0 %v2736_v42, %s2368_s6  ;;  %s2408_s6 = smov 118  }
 0x113   : > { %v491_v62 = vsel %vm489_vm15, %v485_v58, %v487_v60  ;;  %v488_v63 = vsel %vm235_vm0, %v486_v61, %v487_v60 }
 0x114   : > { %495 = vst [vmem:[#allocation2 + $0xbc] sm:$0xf] %v491_v62  ;;  %v490_v1 = vsel %vm489_vm15, %v483_v59, %v488_v63  ;;  %v503_v3 = vpop.permute.xlu1 %502  ;;  %v501_v4 = vpop.permute.xlu0 %500  ;;  %vm705_vm15 = vcmask 457728  }
 0x115   : > { %v505_v5 = vrot.slane %v503_v3, 4  ;;  %v504_v6 = vrot.slane %v501_v4, 4  ;;  %v1935_v7 = vcombine.high %v472_v57, %v490_v1  ;;  %v1934_v9 = vcombine.low %v472_v57, %v490_v1  ;;  %v2171_v57 = vld [vmem:[#allocation2 + $0x20] ss:$12 sps:$4 sm:$0xff]  }
 0x116   : > { %1021 = vrot.lane.b32.xlu1 %v2733_v41, %s2405_s7  ;;  %1019 = vrot.lane.b32.xlu0 %v2736_v42, %s2405_s7  ;;  %s2259_s7 = sshll.u32 %s2409_s1, 4  ;;  %s2260_s7 = int_to_ptr.vmem [resolvable:$false] %s2259_s7 }
 0x117   : > { %v509_v10 = vsel %vm507_vm1, %v503_v3, %v505_v5  ;;  %v506_v11 = vsel %vm235_vm0, %v504_v6, %v505_v5  ;;  %1629 = vmatprep.subr.bf16.mxu0 %v1935_v7 }
 0x118   : > { %513 = vst [vmem:[#allocation2 + $0xc8] sm:$0xf] %v509_v10  ;;  %v508_v12 = vsel %vm507_vm1, %v501_v4, %v506_v11  ;;  %v521_v13 = vpop.permute.xlu1 %520  ;;  %v519_v14 = vpop.permute.xlu0 %518  ;;  %1630 = vmatpush1.bf16.msra.mxu0 %v1934_v9  ;;  %vm723_vm1 = vcmask 326656  }
 0x119   : > { %v523_v15 = vrot.slane %v521_v13, 4  ;;  %v522_v16 = vrot.slane %v519_v14, 4 }
 0x11a   : > { %1039 = vrot.lane.b32.xlu1 %v2733_v41, %s2406_s24  ;;  %1037 = vrot.lane.b32.xlu0 %v2736_v42, %s2406_s24  ;;  %s2261_s24 = scalar_lea.vmem %s2260_s7, 768 }
 0x11b   : > { %v527_v17 = vsel %vm525_vm2, %v521_v13, %v523_v15  ;;  %v524_v18 = vsel %vm235_vm0, %v522_v16, %v523_v15 }
 0x11c   : > { %531 = vst [vmem:[#allocation2 + $0xd4] sm:$0xf] %v527_v17  ;;  %v526_v19 = vsel %vm525_vm2, %v519_v14, %v524_v18  ;;  %v539_v20 = vpop.permute.xlu1 %538  ;;  %v537_v21 = vpop.permute.xlu0 %536  ;;  %v2173_v14 = vld [vmem:[#allocation2 + $0x38] ss:$12 sps:$4 sm:$0xff]   ;;  %vm741_vm2 = vcmask 318464  }
 0x11d   : > { %v541_v22 = vrot.slane %v539_v20, 4  ;;  %v540_v23 = vrot.slane %v537_v21, 4  ;;  %v1938_v24 = vcombine.high %v508_v12, %v526_v19  ;;  %v1937_v25 = vcombine.low %v508_v12, %v526_v19 }
 0x11e   : > { %1057 = vrot.lane.b32.xlu1 %v2733_v41, %s2407_s20  ;;  %1055 = vrot.lane.b32.xlu0 %v2736_v42, %s2407_s20 }
 0x11f   : > { %v545_v26 = vsel %vm543_vm3, %v539_v20, %v541_v22  ;;  %v542_v27 = vsel %vm235_vm0, %v540_v23, %v541_v22  ;;  %1631 = vmatprep.subr.bf16.mxu0 %v1938_v24 }
 0x120   : > { %549 = vst [vmem:[#allocation2 + $0xe0] sm:$0xf] %v545_v26  ;;  %v544_v28 = vsel %vm543_vm3, %v537_v21, %v542_v27  ;;  %v557_v29 = vpop.permute.xlu1 %556  ;;  %v555_v31 = vpop.permute.xlu0 %554  ;;  %1632 = vmatpush1.bf16.msra.mxu0 %v1937_v25  ;;  %vm759_vm3 = vcmask 310272  }
 0x121   : > { %v559_v32 = vrot.slane %v557_v29, 4  ;;  %v558_v33 = vrot.slane %v555_v31, 4 }
 0x122   : > { %1075 = vrot.lane.b32.xlu1 %v2733_v41, %s2408_s6  ;;  %1073 = vrot.lane.b32.xlu0 %v2736_v42, %s2408_s6  ;;  %v1190_v41 = vld [vmem:[%s2895_s2] sm:$0xff] }
 0x123   : > { %v563_v34 = vsel %vm561_vm7, %v557_v29, %v559_v32  ;;  %v560_v35 = vsel %vm235_vm0, %v558_v33, %v559_v32  ;;  %v2168_v36 = vld [vmem:[#allocation2 + $0xc8] ss:$12 sps:$4 sm:$0xff]   ;;  %v2175_v33 = vld [vmem:[#allocation2 + $0x50] ss:$12 sps:$4 sm:$0xff]  }
 0x124   : > { %567 = vst [vmem:[#allocation2 + $0xec] sm:$0xf] %v563_v34  ;;  %v562_v37 = vsel %vm561_vm7, %v555_v31, %v560_v35  ;;  %v575_v38 = vpop.permute.xlu1 %574  ;;  %v573_v39 = vpop.permute.xlu0 %572  ;;  %1995 = vmatprep.subr.bf16.mxu1 %v2168_v36  ;;  %vm777_vm7 = vcmask 302080  }
 0x125   : > { %v577_v43 = vrot.slane %v575_v38, 4  ;;  %v576_v44 = vrot.slane %v573_v39, 4  ;;  %v1941_v45 = vcombine.high %v544_v28, %v562_v37  ;;  %v1940_v46 = vcombine.low %v544_v28, %v562_v37  ;;  %1996 = vmatpush3.bf16.msra.mxu1 %v2169_v40 }
 0x126   : > { %1193 = vperm.xlu0 %2167, %v1190_v41  }
 0x127   : > { %v581_v42 = vsel %vm579_vm8, %v575_v38, %v577_v43  ;;  %v578_v2 = vsel %vm235_vm0, %v576_v44, %v577_v43  ;;  %1633 = vmatprep.subr.bf16.mxu0 %v1941_v45 }
 0x128   : > { %585 = vst [vmem:[#allocation2 + $0xf8] sm:$0xf] %v581_v42  ;;  %v580_v0 = vsel %vm579_vm8, %v573_v39, %v578_v2  ;;  %v593_v47 = vpop.permute.xlu1 %592  ;;  %v591_v48 = vpop.permute.xlu0 %590  ;;  %1634 = vmatpush1.bf16.msra.mxu0 %v1940_v46  ;;  %vm795_vm8 = vcmask 293888  }
 0x129   : > { %v595_v49 = vrot.slane %v593_v47, 4  ;;  %v594_v50 = vrot.slane %v591_v48, 4 }
 0x12b   : > { %v599_v51 = vsel %vm597_vm9, %v593_v47, %v595_v49  ;;  %v596_v52 = vsel %vm235_vm0, %v594_v50, %v595_v49  ;;  %v2170_v53 = vld [vmem:[#allocation2 + $0xe0] ss:$12 sps:$4 sm:$0xff]   ;;  %v2177_v49 = vld [vmem:[#allocation2 + $0x68] ss:$12 sps:$4 sm:$0xff]  }
 0x12c   : > { %603 = vst [vmem:[#allocation2 + $0x104] sm:$0xf] %v599_v51  ;;  %v598_v54 = vsel %vm597_vm9, %v591_v48, %v596_v52  ;;  %v611_v55 = vpop.permute.xlu1 %610  ;;  %v609_v56 = vpop.permute.xlu0 %608  ;;  %1997 = vmatprep.subr.bf16.mxu1 %v2170_v53  ;;  %vm813_vm9 = vcmask 285696  }
 0x12d   : > { %v613_v58 = vrot.slane %v611_v55, 4  ;;  %v612_v59 = vrot.slane %v609_v56, 4  ;;  %v1944_v60 = vcombine.high %v580_v0, %v598_v54  ;;  %v1943_v61 = vcombine.low %v580_v0, %v598_v54  ;;  %1998 = vmatpush3.bf16.msra.mxu1 %v2171_v57 }
 0x12f   : > { %v617_v62 = vsel %vm615_vm10, %v611_v55, %v613_v58  ;;  %v614_v63 = vsel %vm235_vm0, %v612_v59, %v613_v58  ;;  %1635 = vmatprep.subr.bf16.mxu0 %v1944_v60 }
 0x130   : > { %621 = vst [vmem:[#allocation2 + $0x110] sm:$0xf] %v617_v62  ;;  %v616_v1 = vsel %vm615_vm10, %v609_v56, %v614_v63  ;;  %v629_v3 = vpop.permute.xlu1 %628  ;;  %v627_v4 = vpop.permute.xlu0 %626  ;;  %1636 = vmatpush1.bf16.msra.mxu0 %v1943_v61  ;;  %vm1601_vm10 = vcmask 64512  }
 0x131   : > { %v631_v5 = vrot.slane %v629_v3, 4  ;;  %v630_v6 = vrot.slane %v627_v4, 4 }
 0x133   : > { %v635_v7 = vsel %vm633_vm11, %v629_v3, %v631_v5  ;;  %v632_v9 = vsel %vm235_vm0, %v630_v6, %v631_v5  ;;  %v2172_v10 = vld [vmem:[#allocation2 + $0xf8] ss:$12 sps:$4 sm:$0xff]   ;;  %v2179_v5 = vld [vmem:[#allocation2 + $0x80] ss:$12 sps:$4 sm:$0xff]  }
 0x134   : > { %639 = vst [vmem:[#allocation2 + $0x11c] sm:$0xf] %v635_v7  ;;  %v634_v11 = vsel %vm633_vm11, %v627_v4, %v632_v9  ;;  %v647_v12 = vpop.permute.xlu1 %646  ;;  %v645_v13 = vpop.permute.xlu0 %644  ;;  %1999 = vmatprep.subr.bf16.mxu1 %v2172_v10  ;;  %vm831_vm11 = vcmask 277504  }
 0x135   : > { %v649_v15 = vrot.slane %v647_v12, 4  ;;  %v648_v16 = vrot.slane %v645_v13, 4  ;;  %v1947_v17 = vcombine.high %v616_v1, %v634_v11  ;;  %v1946_v18 = vcombine.low %v616_v1, %v634_v11  ;;  %2000 = vmatpush3.bf16.msra.mxu1 %v2173_v14 }
 0x137   : > { %v653_v19 = vsel %vm651_vm12, %v647_v12, %v649_v15  ;;  %v650_v20 = vsel %vm235_vm0, %v648_v16, %v649_v15  ;;  %1637 = vmatprep.subr.bf16.mxu0 %v1947_v17 }
 0x138   : > { %657 = vst [vmem:[#allocation2 + $0x128] sm:$0xf] %v653_v19  ;;  %v652_v21 = vsel %vm651_vm12, %v645_v13, %v650_v20  ;;  %v665_v22 = vpop.permute.xlu1 %664  ;;  %v663_v23 = vpop.permute.xlu0 %662  ;;  %1638 = vmatpush1.bf16.msra.mxu0 %v1946_v18  ;;  %vm849_vm12 = vcmask 146432  }
 0x139   : > { %v667_v24 = vrot.slane %v665_v22, 4  ;;  %v666_v25 = vrot.slane %v663_v23, 4 }
 0x13b   : > { %v671_v26 = vsel %vm669_vm13, %v665_v22, %v667_v24  ;;  %v668_v27 = vsel %vm235_vm0, %v666_v25, %v667_v24  ;;  %v2174_v28 = vld [vmem:[#allocation2 + $0x110] ss:$12 sps:$4 sm:$0xff]   ;;  %v2181_v24 = vld [vmem:[#allocation2 + $0x98] ss:$12 sps:$4 sm:$0xff]  }
 0x13c   : > { %675 = vst [vmem:[#allocation2 + $0x134] sm:$0xf] %v671_v26  ;;  %v670_v29 = vsel %vm669_vm13, %v663_v23, %v668_v27  ;;  %v683_v31 = vpop.permute.xlu1 %682  ;;  %v681_v32 = vpop.permute.xlu0 %680  ;;  %2001 = vmatprep.subr.bf16.mxu1 %v2174_v28  ;;  %vm867_vm13 = vcmask 138240  }
 0x13d   : > { %v685_v34 = vrot.slane %v683_v31, 4  ;;  %v684_v35 = vrot.slane %v681_v32, 4  ;;  %v1950_v36 = vcombine.high %v652_v21, %v670_v29  ;;  %v1949_v37 = vcombine.low %v652_v21, %v670_v29  ;;  %2002 = vmatpush3.bf16.msra.mxu1 %v2175_v33  ;;  %v2784_v29 = vld [vmem:[%s2677_s22 + $0x8] sm:$0xff]  ;;  %s2027_s22 = smul.u32 24, %s2589_s27 }
 0x13e   : > { %v1909_v33 = vcombine.low %v2680_v8, %v2680_v8 }
 0x13f   : > { %v689_v38 = vsel %vm687_vm14, %v683_v31, %v685_v34  ;;  %v686_v39 = vsel %vm235_vm0, %v684_v35, %v685_v34  ;;  %1639 = vmatprep.subr.bf16.mxu0 %v1950_v36  ;;  %s219_s4 = scalar_lea.vmem [#allocation8], %s2027_s22 }
 0x140   : > { %693 = vst [vmem:[#allocation2 + $0x140] sm:$0xf] %v689_v38  ;;  %v688_v40 = vsel %vm687_vm14, %v681_v32, %v686_v39  ;;  %v701_v43 = vpop.permute.xlu1 %700  ;;  %v699_v44 = vpop.permute.xlu0 %698  ;;  %1640 = vmatpush1.bf16.msra.mxu0 %v1949_v37  ;;  %v1912_v37 = vcombine.high %v2784_v29, %v2784_v29  ;;  %vm885_vm14 = vcmask 130048   ;;  %s1800_s15 = sshll.u32 %s219_s4, 4  ;;  %s2841_s15 = int_to_ptr.vmem [resolvable:$true] %s1800_s15 }
 0x141   : > { %v703_v45 = vrot.slane %v701_v43, 4  ;;  %v702_v46 = vrot.slane %v699_v44, 4  ;;  %s2255_s5 = scalar_lea.vmem %s2841_s15, 384  ;;  %p2262_p12 = scmp.lt.s32.totalorder %s2841_s15, %s2260_s7 }
 0x142   : > { %p2256_p6 = scmp.ne.s32.totalorder %s2841_s15, %s2255_s5  ;;  %p2263_p13 = scmp.lt.s32.totalorder %s2261_s24, %s2255_s5 }
 0x143   : > { %v707_v41 = vsel %vm705_vm15, %v701_v43, %v703_v45  ;;  %v704_v42 = vsel %vm235_vm0, %v702_v46, %v703_v45  ;;  %v2176_v2 = vld [vmem:[#allocation2 + $0x128] ss:$12 sps:$4 sm:$0xff]  }
 0x144   : > { %711 = vst [vmem:[#allocation2 + $0x14c] sm:$0xf] %v707_v41  ;;  %v706_v0 = vsel %vm705_vm15, %v699_v44, %v704_v42  ;;  %v719_v47 = vpop.permute.xlu1 %718  ;;  %v717_v48 = vpop.permute.xlu0 %716  ;;  %2003 = vmatprep.subr.bf16.mxu1 %v2176_v2  ;;  %v2183_v41 = vld [vmem:[#allocation2 + $0xb0] ss:$12 sps:$4 sm:$0xff]   ;;  %vm903_vm15 = vcmask 121856   ;;  %p2257_p8 = pnand %p2256_p6, %p2535_p11  ;;  %p2264_p3 = por %p2263_p13, %p2262_p12 }
 0x145   : > { %v721_v50 = vrot.slane %v719_v47, 4  ;;  %v720_v51 = vrot.slane %v717_v48, 4  ;;  %v1953_v52 = vcombine.high %v688_v40, %v706_v0  ;;  %v1952_v53 = vcombine.low %v688_v40, %v706_v0  ;;  %2004 = vmatpush3.bf16.msra.mxu1 %v2177_v49 }
 0x146   : > { %p2258_p10 = pneg %p2257_p8 }
 0x147   : > { %v725_v54 = vsel %vm723_vm1, %v719_v47, %v721_v50  ;;  %v722_v55 = vsel %vm235_vm0, %v720_v51, %v721_v50  ;;  %1641 = vmatprep.subr.bf16.mxu0 %v1953_v52 }
 0x148   : > { %729 = vst [vmem:[#allocation2 + $0x158] sm:$0xf] %v725_v54  ;;  %v724_v56 = vsel %vm723_vm1, %v717_v48, %v722_v55  ;;  %v737_v57 = vpop.permute.xlu1 %736  ;;  %v735_v58 = vpop.permute.xlu0 %734  ;;  %1642 = vmatpush1.bf16.msra.mxu0 %v1952_v53  ;;  %vm921_vm1 = vcmask 113664   ;;  %p2265_p7 = pnand %p2264_p3, %p2258_p10 }
 0x149   : > { %v739_v59 = vrot.slane %v737_v57, 4  ;;  %v738_v60 = vrot.slane %v735_v58, 4 }
 0x14b   : > { %v743_v61 = vsel %vm741_vm2, %v737_v57, %v739_v59  ;;  %v740_v62 = vsel %vm235_vm0, %v738_v60, %v739_v59  ;;  %v2178_v63 = vld [vmem:[#allocation2 + $0x140] ss:$12 sps:$4 sm:$0xff]  }
 0x14c   : > { %747 = vst [vmem:[#allocation2 + $0x164] sm:$0xf] %v743_v61  ;;  %v742_v1 = vsel %vm741_vm2, %v735_v58, %v740_v62  ;;  %v755_v3 = vpop.permute.xlu1 %754  ;;  %v753_v4 = vpop.permute.xlu0 %752  ;;  %2005 = vmatprep.subr.bf16.mxu1 %v2178_v63  ;;  %vm939_vm2 = vcmask 105472  }
 0x14d   : > { %v757_v6 = vrot.slane %v755_v3, 4  ;;  %v756_v7 = vrot.slane %v753_v4, 4  ;;  %v1956_v9 = vcombine.high %v724_v56, %v742_v1  ;;  %v1955_v10 = vcombine.low %v724_v56, %v742_v1  ;;  %2006 = vmatpush3.bf16.msra.mxu1 %v2179_v5 }
 0x14f   : > { %v761_v11 = vsel %vm759_vm3, %v755_v3, %v757_v6  ;;  %v758_v12 = vsel %vm235_vm0, %v756_v7, %v757_v6  ;;  %1643 = vmatprep.subr.bf16.mxu0 %v1956_v9 }
 0x150   : > { %765 = vst [vmem:[#allocation2 + $0x170] sm:$0xf] %v761_v11  ;;  %v760_v13 = vsel %vm759_vm3, %v753_v4, %v758_v12  ;;  %v773_v14 = vpop.permute.xlu1 %772  ;;  %v771_v15 = vpop.permute.xlu0 %770  ;;  %1644 = vmatpush1.bf16.msra.mxu0 %v1955_v10  ;;  %vm957_vm3 = vcmask 97280  }
 0x151   : > { %v775_v16 = vrot.slane %v773_v14, 4  ;;  %v774_v17 = vrot.slane %v771_v15, 4 }
 0x153   : > { %v779_v18 = vsel %vm777_vm7, %v773_v14, %v775_v16  ;;  %v776_v19 = vsel %vm235_vm0, %v774_v17, %v775_v16  ;;  %v2180_v20 = vld [vmem:[#allocation2 + $0x158] ss:$12 sps:$4 sm:$0xff]  }
 0x154   : > { %783 = vst [vmem:[#allocation2 + $0x17c] sm:$0xf] %v779_v18  ;;  %v778_v21 = vsel %vm777_vm7, %v771_v15, %v776_v19  ;;  %v791_v22 = vpop.permute.xlu1 %790  ;;  %v789_v23 = vpop.permute.xlu0 %788  ;;  %2007 = vmatprep.subr.bf16.mxu1 %v2180_v20  ;;  %vm1080_vm7 = vcmask 965632  }
 0x155   : > { %v793_v25 = vrot.slane %v791_v22, 4  ;;  %v792_v26 = vrot.slane %v789_v23, 4  ;;  %v1959_v27 = vcombine.high %v760_v13, %v778_v21  ;;  %v1958_v28 = vcombine.low %v760_v13, %v778_v21  ;;  %2008 = vmatpush3.bf16.msra.mxu1 %v2181_v24 }
 0x157   : > { %v797_v31 = vsel %vm795_vm8, %v791_v22, %v793_v25  ;;  %v794_v32 = vsel %vm235_vm0, %v792_v26, %v793_v25  ;;  %1645 = vmatprep.subr.bf16.mxu0 %v1959_v27 }
 0x158   : > { %801 = vst [vmem:[#allocation2 + $0x188] sm:$0xf] %v797_v31  ;;  %v796_v34 = vsel %vm795_vm8, %v789_v23, %v794_v32  ;;  %v809_v35 = vpop.permute.xlu1 %808  ;;  %v807_v36 = vpop.permute.xlu0 %806  ;;  %1646 = vmatpush1.bf16.msra.mxu0 %v1958_v28 }
 0x159   : > { %v811_v38 = vrot.slane %v809_v35, 4  ;;  %v810_v39 = vrot.slane %v807_v36, 4 }
 0x15b   : > { %v815_v40 = vsel %vm813_vm9, %v809_v35, %v811_v38  ;;  %v812_v43 = vsel %vm235_vm0, %v810_v39, %v811_v38  ;;  %v2182_v44 = vld [vmem:[#allocation2 + $0x170] ss:$12 sps:$4 sm:$0xff]   ;;  %1648 = vmatmul.mubr.bf16.vlgmr.msra.gmra.mrb[0].mxu0 %v1909_v33 }
 0x15c   : > { %819 = vst [vmem:[#allocation2 + $0x194] sm:$0xf] %v815_v40  ;;  %v814_v8 = vsel %vm813_vm9, %v807_v36, %v812_v43  ;;  %v827_v45 = vpop.permute.xlu1 %826  ;;  %v825_v46 = vpop.permute.xlu0 %824  ;;  %1989 = vmatprep.mubr.msk.bf16.mxu0 %vm1601_vm10, %v1912_v37  ;;  %2009 = vmatprep.subr.bf16.mxu1 %v2182_v44 }
 0x15d   : > { %v829_v42 = vrot.slane %v827_v45, 4  ;;  %v828_v2 = vrot.slane %v825_v46, 4  ;;  %v1961_v0 = vcombine.low %v796_v34, %v814_v8  ;;  %v1962_v47 = vcombine.high %v796_v34, %v814_v8  ;;  %2010 = vmatpush3.bf16.msra.mxu1 %v2183_v41 }
 0x15e   : > { %1737 = vmatprep.subr.bf16.mxu1 %v2395_v30 }
 0x15f   : > { %v833_v48 = vsel %vm831_vm11, %v827_v45, %v829_v42  ;;  %v830_v49 = vsel %vm235_vm0, %v828_v2, %v829_v42  ;;  %1656 = vmatprep.subr.bf16.mxu0 %v1962_v47 }
 0x160   : > { %837 = vst [vmem:[#allocation2 + $0x1a0] sm:$0xf] %v833_v48  ;;  %v832_v50 = vsel %vm831_vm11, %v825_v46, %v830_v49  ;;  %v845_v51 = vpop.permute.xlu1 %844  ;;  %v843_v52 = vpop.permute.xlu0 %842  ;;  %1657 = vmatpush1.bf16.msra.mxu0 %v1961_v0  ;;  %1730 = vmatmul.mubr.bf16.vlgmr.msra.gmra.mrb[0].mxu1 %v1909_v33 }
 0x161   : > { %v847_v53 = vrot.slane %v845_v51, 4  ;;  %v846_v54 = vrot.slane %v843_v52, 4  ;;  %1990 = vmatprep.mubr.msk.bf16.mxu1 %vm1601_vm10, %v1912_v37 }
 0x163   : > { %v851_v55 = vsel %vm849_vm12, %v845_v51, %v847_v53  ;;  %v848_v56 = vsel %vm235_vm0, %v846_v54, %v847_v53  ;;  %v2188_v57 = vld [vmem:[#allocation2 + $0x188] ss:$12 sps:$4 sm:$0xff]  }
 0x164   : > { %855 = vst [vmem:[#allocation2 + $0x1ac] sm:$0xf] %v851_v55  ;;  %v850_v58 = vsel %vm849_vm12, %v843_v52, %v848_v56  ;;  %v863_v59 = vpop.permute.xlu1 %862  ;;  %v861_v60 = vpop.permute.xlu0 %860  ;;  %1738 = vmatpush1.bf16.msra.mxu1 %v2188_v57 }
 0x165   : > { %v865_v61 = vrot.slane %v863_v59, 4  ;;  %v864_v62 = vrot.slane %v861_v60, 4  ;;  %v1964_v63 = vcombine.low %v832_v50, %v850_v58  ;;  %v1965_v1 = vcombine.high %v832_v50, %v850_v58  ;;  %1739 = vmatprep.subr.bf16.mxu1 %v2395_v30 }
 0x167   : > { %v869_v3 = vsel %vm867_vm13, %v863_v59, %v865_v61  ;;  %v866_v4 = vsel %vm235_vm0, %v864_v62, %v865_v61  ;;  %1658 = vmatprep.subr.bf16.mxu0 %v1965_v1 }
 0x168   : > { %873 = vst [vmem:[#allocation2 + $0x1b8] sm:$0xf] %v869_v3  ;;  %v868_v5 = vsel %vm867_vm13, %v861_v60, %v866_v4  ;;  %v881_v6 = vpop.permute.xlu1 %880  ;;  %v879_v7 = vpop.permute.xlu0 %878  ;;  %1659 = vmatpush1.bf16.msra.mxu0 %v1964_v63 }
 0x169   : > { %v883_v9 = vrot.slane %v881_v6, 4  ;;  %v882_v10 = vrot.slane %v879_v7, 4 }
 0x16b   : > { %v887_v11 = vsel %vm885_vm14, %v881_v6, %v883_v9  ;;  %v884_v12 = vsel %vm235_vm0, %v882_v10, %v883_v9  ;;  %v2189_v13 = vld [vmem:[#allocation2 + $0x1a0] ss:$12 sps:$4 sm:$0xff]  }
 0x16c   : > { %891 = vst [vmem:[#allocation2 + $0x1c4] sm:$0xf] %v887_v11  ;;  %v886_v14 = vsel %vm885_vm14, %v879_v7, %v884_v12  ;;  %v899_v15 = vpop.permute.xlu1 %898  ;;  %v897_v16 = vpop.permute.xlu0 %896  ;;  %1740 = vmatpush1.bf16.msra.mxu1 %v2189_v13 }
 0x16d   : > { %v901_v17 = vrot.slane %v899_v15, 4  ;;  %v900_v18 = vrot.slane %v897_v16, 4  ;;  %v1967_v19 = vcombine.low %v868_v5, %v886_v14  ;;  %v1968_v20 = vcombine.high %v868_v5, %v886_v14  ;;  %1741 = vmatprep.subr.bf16.mxu1 %v2395_v30 }
 0x16f   : > { %v905_v21 = vsel %vm903_vm15, %v899_v15, %v901_v17  ;;  %v902_v22 = vsel %vm235_vm0, %v900_v18, %v901_v17  ;;  %1660 = vmatprep.subr.bf16.mxu0 %v1968_v20 }
 0x170   : > { %909 = vst [vmem:[#allocation2 + $0x1d0] sm:$0xf] %v905_v21  ;;  %v904_v23 = vsel %vm903_vm15, %v897_v16, %v902_v22  ;;  %v917_v24 = vpop.permute.xlu1 %916  ;;  %v915_v25 = vpop.permute.xlu0 %914  ;;  %1661 = vmatpush1.bf16.msra.mxu0 %v1967_v19 }
 0x171   : > { %v919_v26 = vrot.slane %v917_v24, 4  ;;  %v918_v27 = vrot.slane %v915_v25, 4 }
 0x173   : > { %v923_v28 = vsel %vm921_vm1, %v917_v24, %v919_v26  ;;  %v920_v31 = vsel %vm235_vm0, %v918_v27, %v919_v26  ;;  %v2190_v32 = vld [vmem:[#allocation2 + $0x1b8] ss:$12 sps:$4 sm:$0xff]  }
 0x174   : > { %927 = vst [vmem:[#allocation2 + $0x1dc] sm:$0xf] %v923_v28  ;;  %v922_v33 = vsel %vm921_vm1, %v915_v25, %v920_v31  ;;  %v935_v34 = vpop.permute.xlu1 %934  ;;  %v933_v35 = vpop.permute.xlu0 %932  ;;  %1742 = vmatpush1.bf16.msra.mxu1 %v2190_v32 }
 0x175   : > { %v937_v36 = vrot.slane %v935_v34, 4  ;;  %v936_v37 = vrot.slane %v933_v35, 4  ;;  %v1970_v38 = vcombine.low %v904_v23, %v922_v33  ;;  %v1971_v39 = vcombine.high %v904_v23, %v922_v33  ;;  %1743 = vmatprep.subr.bf16.mxu1 %v2395_v30 }
 0x177   : > { %v941_v40 = vsel %vm939_vm2, %v935_v34, %v937_v36  ;;  %v938_v43 = vsel %vm235_vm0, %v936_v37, %v937_v36  ;;  %1662 = vmatprep.subr.bf16.mxu0 %v1971_v39 }
 0x178   : > { %945 = vst [vmem:[#allocation2 + $0x1e8] sm:$0xf] %v941_v40  ;;  %v940_v44 = vsel %vm939_vm2, %v933_v35, %v938_v43  ;;  %v953_v8 = vpop.permute.xlu1 %952  ;;  %v951_v45 = vpop.permute.xlu0 %950  ;;  %1663 = vmatpush1.bf16.msra.mxu0 %v1970_v38 }
 0x179   : > { %v955_v46 = vrot.slane %v953_v8, 4  ;;  %v954_v41 = vrot.slane %v951_v45, 4 }
 0x17b   : > { %v959_v42 = vsel %vm957_vm3, %v953_v8, %v955_v46  ;;  %v956_v2 = vsel %vm235_vm0, %v954_v41, %v955_v46  ;;  %v2191_v0 = vld [vmem:[#allocation2 + $0x1d0] ss:$12 sps:$4 sm:$0xff]  }
 0x17c   : > { %963 = vst [vmem:[#allocation2 + $0x1f4] sm:$0xf] %v959_v42  ;;  %v958_v47 = vsel %vm957_vm3, %v951_v45, %v956_v2  ;;  %v971_v48 = vpop.permute.xlu1 %970  ;;  %v969_v49 = vpop.permute.xlu0 %968  ;;  %1744 = vmatpush1.bf16.msra.mxu1 %v2191_v0 }
 0x17d   : > { %v973_v50 = vrot.slane %v971_v48, 4  ;;  %v972_v51 = vrot.slane %v969_v49, 4  ;;  %v1973_v52 = vcombine.low %v940_v44, %v958_v47  ;;  %v1974_v53 = vcombine.high %v940_v44, %v958_v47  ;;  %1745 = vmatprep.subr.bf16.mxu1 %v2395_v30 }
 0x17f   : > { %v976_v54 = vsel %vm291_vm4, %v971_v48, %v973_v50  ;;  %v974_v55 = vsel %vm235_vm0, %v972_v51, %v973_v50  ;;  %1664 = vmatprep.subr.bf16.mxu0 %v1974_v53  ;;  %v1911_v48 = vcombine.low %v2784_v29, %v2784_v29 }
 0x180   : > { %980 = vst [vmem:[#allocation2 + $0x200] sm:$0xf] %v976_v54  ;;  %v975_v56 = vsel %vm291_vm4, %v969_v49, %v974_v55  ;;  %v988_v57 = vpop.permute.xlu1 %987  ;;  %v986_v58 = vpop.permute.xlu0 %985  ;;  %1665 = vmatpush1.bf16.msra.mxu0 %v1973_v52  ;;  %vm1026_vm4 = vcmask 990208  }
 0x181   : > { %v990_v59 = vrot.slane %v988_v57, 4  ;;  %v989_v60 = vrot.slane %v986_v58, 4 }
 0x183   : > { %v993_v61 = vsel %vm309_vm5, %v988_v57, %v990_v59  ;;  %v991_v62 = vsel %vm235_vm0, %v989_v60, %v990_v59  ;;  %v2192_v63 = vld [vmem:[#allocation2 + $0x1e8] ss:$12 sps:$4 sm:$0xff]  }
 0x184   : > { %997 = vst [vmem:[#allocation2 + $0x20c] sm:$0xf] %v993_v61  ;;  %v992_v1 = vsel %vm309_vm5, %v986_v58, %v991_v62  ;;  %v1005_v3 = vpop.permute.xlu1 %1004  ;;  %v1003_v4 = vpop.permute.xlu0 %1002  ;;  %1746 = vmatpush1.bf16.msra.mxu1 %v2192_v63  ;;  %vm1044_vm5 = vcmask 982016  }
 0x185   : > { %v1007_v5 = vrot.slane %v1005_v3, 4  ;;  %v1006_v6 = vrot.slane %v1003_v4, 4  ;;  %v1976_v7 = vcombine.low %v975_v56, %v992_v1  ;;  %v1977_v9 = vcombine.high %v975_v56, %v992_v1  ;;  %1747 = vmatprep.subr.bf16.mxu1 %v2395_v30 }
 0x187   : > { %v1010_v10 = vsel %vm327_vm6, %v1005_v3, %v1007_v5  ;;  %v1008_v11 = vsel %vm235_vm0, %v1006_v6, %v1007_v5  ;;  %1666 = vmatprep.subr.bf16.mxu0 %v1977_v9 }
 0x188   : > { %1014 = vst [vmem:[#allocation2 + $0x218] sm:$0xf] %v1010_v10  ;;  %v1009_v12 = vsel %vm327_vm6, %v1003_v4, %v1008_v11  ;;  %v1022_v13 = vpop.permute.xlu1 %1021  ;;  %v1020_v14 = vpop.permute.xlu0 %1019  ;;  %1667 = vmatpush1.bf16.msra.mxu0 %v1976_v7  ;;  %vm1062_vm6 = vcmask 973824  }
 0x189   : > { %v1024_v15 = vrot.slane %v1022_v13, 4  ;;  %v1023_v16 = vrot.slane %v1020_v14, 4 }
 0x18b   : > { %v1028_v17 = vsel %vm1026_vm4, %v1022_v13, %v1024_v15  ;;  %v1025_v18 = vsel %vm235_vm0, %v1023_v16, %v1024_v15  ;;  %v2193_v19 = vld [vmem:[#allocation2 + $0x200] ss:$12 sps:$4 sm:$0xff]  }
 0x18c   : > { %1032 = vst [vmem:[#allocation2 + $0x224] sm:$0xf] %v1028_v17  ;;  %v1027_v20 = vsel %vm1026_vm4, %v1020_v14, %v1025_v18  ;;  %v1040_v21 = vpop.permute.xlu1 %1039  ;;  %v1038_v22 = vpop.permute.xlu0 %1037  ;;  %1748 = vmatpush1.bf16.msra.mxu1 %v2193_v19 }
 0x18d   : > { %v1042_v23 = vrot.slane %v1040_v21, 4  ;;  %v1041_v24 = vrot.slane %v1038_v22, 4  ;;  %v1979_v25 = vcombine.low %v1009_v12, %v1027_v20  ;;  %v1980_v26 = vcombine.high %v1009_v12, %v1027_v20  ;;  %1749 = vmatprep.subr.bf16.mxu1 %v2395_v30 }
 0x18f   : > { %v1046_v27 = vsel %vm1044_vm5, %v1040_v21, %v1042_v23  ;;  %v1043_v28 = vsel %vm235_vm0, %v1041_v24, %v1042_v23  ;;  %1668 = vmatprep.subr.bf16.mxu0 %v1980_v26 }
 0x190   : > { %1050 = vst [vmem:[#allocation2 + $0x230] sm:$0xf] %v1046_v27  ;;  %v1045_v31 = vsel %vm1044_vm5, %v1038_v22, %v1043_v28  ;;  %v1058_v32 = vpop.permute.xlu1 %1057  ;;  %v1056_v33 = vpop.permute.xlu0 %1055  ;;  %1669 = vmatpush1.bf16.msra.mxu0 %v1979_v25 }
 0x191   : > { %v1060_v34 = vrot.slane %v1058_v32, 4  ;;  %v1059_v35 = vrot.slane %v1056_v33, 4 }
 0x193   : > { %v1064_v36 = vsel %vm1062_vm6, %v1058_v32, %v1060_v34  ;;  %v1061_v37 = vsel %vm235_vm0, %v1059_v35, %v1060_v34  ;;  %v2194_v38 = vld [vmem:[#allocation2 + $0x218] ss:$12 sps:$4 sm:$0xff]  }
 0x194   : > { %1068 = vst [vmem:[#allocation2 + $0x23c] sm:$0xf] %v1064_v36  ;;  %v1063_v39 = vsel %vm1062_vm6, %v1056_v33, %v1061_v37  ;;  %v1076_v40 = vpop.permute.xlu1 %1075  ;;  %v1074_v43 = vpop.permute.xlu0 %1073  ;;  %1750 = vmatpush1.bf16.msra.mxu1 %v2194_v38 }
 0x195   : > { %v1078_v44 = vrot.slane %v1076_v40, 4  ;;  %v1077_v8 = vrot.slane %v1074_v43, 4  ;;  %v1982_v45 = vcombine.low %v1045_v31, %v1063_v39  ;;  %v1983_v46 = vcombine.high %v1045_v31, %v1063_v39  ;;  %1751 = vmatprep.subr.bf16.mxu1 %v2395_v30 }
 0x197   : > { %v1082_v41 = vsel %vm1080_vm7, %v1076_v40, %v1078_v44  ;;  %v1079_v42 = vsel %vm235_vm0, %v1077_v8, %v1078_v44  ;;  %1670 = vmatprep.subr.bf16.mxu0 %v1983_v46 }
 0x198   : > { %1086 = vst [vmem:[#allocation2 + $0x248] sm:$0xf] %v1082_v41  ;;  %v1081_v2 = vsel %vm1080_vm7, %v1074_v43, %v1079_v42  ;;  %1671 = vmatpush1.bf16.msra.mxu0 %v1982_v45 }
 0x199   : > { %v1986_v0 = vcombine.high %v1081_v2, %v1081_v2  ;;  %v1985_v47 = vcombine.low %v1081_v2, %v1081_v2 }
 0x19b   : > { %v2195_v49 = vld [vmem:[#allocation2 + $0x230] ss:$12 sps:$4 sm:$0xff]   ;;  %1988 = vmatprep.subr.msk.bf16.mxu0 %vm235_vm0, %v1986_v0  ;;  %v1607_v50 = vsel %vm235_vm0, %v1985_v47, 0 }
 0x19c   : > { %1673 = vmatpush1.bf16.msra.mxu0 %v1607_v50  ;;  %1752 = vmatpush1.bf16.msra.mxu1 %v2195_v49 }
 0x19d   : > { %1753 = vmatprep.subr.bf16.mxu1 %v2395_v30 }
 0x19f   : > { %v2196_v51 = vld [vmem:[#allocation2 + $0x248] ss:$0 sps:$4 sm:$0xff]   ;;  %1689 = vmatmul.mubr.bf16.vlgmr.msra.gmra.mrb[0].mxu0 %v1911_v48 }
 0x1a0   : > { %v1613_v52 = vsel %vm235_vm0, %v2196_v51, 0 }
 0x1a1   : > { %1754 = vmatpush1.bf16.msra.mxu1 %v1613_v52 }
 0x1a4   : > { %1770 = vmatmul.mubr.bf16.vlgmr.msra.gmra.mrb[4].mxu1 %v1911_v48 }
 0x1a5   : > { %v1194_v57 = vpop.permute.xlu0 %1193 }
 0x233   : > { %v2011_v53 = vpop.f32.mrb[0].mxu1 }
 0x234   : > { %v2012_v29 = vpop.f32.mrb[1].mxu1 }
 0x235   : > { %v2013_v54 = vadd.f32 %v2012_v29, %v2011_v53  ;;  %v2014_v55 = vpop.f32.mrb[2].mxu1 }
 0x236   : > { %v2015_v56 = vpop.f32.mrb[3].mxu1 }
 0x237   : > { %v1732_v3 = vadd.f32 %v2013_v54, %v1194_v57 }
 0x272   : > { %v1690_v58 = vpop.f32.mrb[0].mxu0 }
 0x273   : > { %v2017_v59 = vadd.f32 %v1690_v58, %v1194_v57  ;;  %v1692_v60 = vpop.f32.mrb[1].mxu0 }
 0x274   : > { %v2018_v61 = vadd.f32 %v1692_v60, %v1194_v57  ;;  %v1694_v30 = vpop.f32.mrb[2].mxu0 }
 0x275   : > { %v1777_v62 = vmax.f32 %v2017_v59, 0.0  ;;  %v1695_v63 = vpop.f32.mrb[3].mxu0 }
 0x276   : > { %v1778_v1 = vmax.f32 %v2018_v61, 0.0 }
 0x277   : > { %1780 = vst [vmem:[%s219_s4] sm:$0xff] %v1777_v62  ;;  %v1771_v4 = vpop.f32.mrb[4].mxu1 }
 0x278   : > { %1781 = vst [vmem:[%s219_s4 + $0x8] sm:$0xff] %v1778_v1  ;;  %v1772_v5 = vadd.f32 %v1771_v4, %v1732_v3  ;;  %v1773_v6 = vpop.f32.mrb[5].mxu1 }
 0x279   : > { %v1774_v7 = vpop.f32.mrb[6].mxu1 }
 0x27a   : > { %v1779_v9 = vmax.f32 %v1772_v5, 0.0  ;;  %v1775_v10 = vpop.f32.mrb[7].mxu1 }
 0x27c   : > { %1782 = vst [vmem:[%s219_s4 + $0x10] sm:$0xff] %v1779_v9 }
 0x27d   : > { %2268 = shalt.err (!%p2265_p7)
}
 0x27e   : > { %s2269_s27 = scalar_lea.hbm %s2839_s21, 384  ;;  %s2273_s26 = scalar_lea.hbm %s2896_s3, 2304 }
 0x27f   : > { %p2270_p1 = scmp.ne.s32.totalorder %s2839_s21, %s2269_s27  ;;  %p2274_p9 = scmp.lt.u32.totalorder %s2839_s21, %s2896_s3 }
 0x280   : > { %p2275_p5 = scmp.lt.u32.totalorder %s2273_s26, %s2269_s27  ;;  %p2277_p6 = scmp.lt.u32.totalorder %s2269_s27, %s2839_s21 }
 0x281   : > { %p2271_p2 = pnand %p2270_p1, %p2535_p11 }
 0x282   : > { %p2276_p0 = por %p2275_p5, %p2274_p9 }
 0x283   : > { %p2272_p4 = pneg %p2271_p2 }
 0x284   : > { %p2278_p8 = por %p2277_p6, %p2276_p0 }
 0x286   : > { %p2279_p10 = pnand %p2278_p8, %p2272_p4 }
 0x288   : > { %2282 = shalt.err (!%p2279_p10)
}
 0x289   : > { %2036 = dma.vmem_to_hbm [thread:$0]  (%p2535_p11), %s2841_s15, 384, %s2839_s21, %s1784_s9  }
 0x28a PF: > { %p2053_p12 = scmp.ge.s32.totalorder %s2357_s19, 2  ;;  %s1812_s10 = sand.u32 1, %s2329_s12  }
 0x28b   : > { %p2921_p13 = scmp.ne.s32.totalorder %s2909_s25, 0  ;;  %s1813_s17 = scalar_lea.sflag [#allocation5], %s1812_s10 }
 0x28d   : > { %p2047_p3 = pnand %p2053_p12, %p2921_p13 }
 0x28f   : > { %2324 = dma.done.wait (!%p2047_p3), %s1813_s17, 384  }
 0x290   : > { %2326 = vsyncadd (!%p2047_p3), %s1813_s17, 4294966912  ;;  %s20_s19 = sadd.s32 1, %s2357_s19   ;;  %s2922_s15 = sld [smem:[#allocation12_spill]] }
 0x291   : > { %p17_p7 = scmp.ge.s32.totalorder %s20_s19, 8   ;;  %s2923_s17 = sld [smem:[#allocation13_spill]] }
 0x292   : > { %s2924_s29 = sld [smem:[#allocation14_spill]]  ;;  %s2925_s12 = smov %s2333_s13 }
 0x293   : > { %s2926_s13 = smov %s2337_s14  ;;  %s2927_s14 = smov %s2552_s23 }
 0x294   : > { %s2928_s16 = smov %s2353_s18  ;;  %19 = sbr.rel (!%p17_p7) target bundleno = 10 (0xa), region = 82 }
 0x298   : > { %s2929_s18 = smov %s2924_s29 }
 0x29b   :  { %1818 = vsyncpa [#allocation4], 1 }
 0x29c   :  { %1820 = vsyncpa [#allocation4 + $0x1], 1 }
 0x29d   :  { %1821 = vsyncpa [#allocation7], 1 }
 0x29e   :  { %1822 = vsyncpa [#allocation5], 1 }
 0x29f   :  { %1824 = vsyncpa [#allocation5 + $0x1], 1 }

</bundles_post_ra>
